<compile_context>
chip_gen: v7x
topology: tpu7x:2x2x1
jax: 0.10.0
libtpu: 0.0.40
codegen_flags: <defaults>
</compile_context>

<pallas_src>
import functools

import numpy as np
import jax
import jax.numpy as jnp
from jax.experimental import pallas as pl
from jax.experimental.pallas import tpu as pltpu

EFF_BN_EPS = 1e-3   # EfficientNet BatchNorm eps
DEC_BN_EPS = 1e-5   # nn.BatchNorm2d default eps (decoder)


def _vmem_limit_bytes():
    """Generation-aware scoped-VMEM limit (v5e/v6e: 128 MiB phys, v7x: 64 MiB)."""
    cap = 64 * 1024 * 1024                      # conservative fallback (v7x size)
    try:
        info = pltpu.get_tpu_info()
        cap = int(getattr(info, "vmem_capacity_bytes", cap))
    except Exception:
        pass
    return min(cap * 3 // 4, 100 * 1024 * 1024)


VMEM_LIMIT = _vmem_limit_bytes()
GEMM_BUDGET = VMEM_LIMIT // 2                   # headroom for Mosaic-internal scratch


# ---------------------------------------------------------------------------
# EfficientNet-B2 block configuration (width=1.1, depth=1.2 -> 23 blocks).
# (in_ch, out_ch, kernel, stride, expand_ratio, static_same_pad (lo, hi))
# ---------------------------------------------------------------------------
BLOCK_CFG = [
    (32, 16, 3, 1, 1, (1, 1)),
    (16, 16, 3, 1, 1, (1, 1)),
    (16, 24, 3, 2, 6, (0, 1)),
    (24, 24, 3, 1, 6, (1, 1)),
    (24, 24, 3, 1, 6, (1, 1)),
    (24, 48, 5, 2, 6, (2, 2)),
    (48, 48, 5, 1, 6, (2, 2)),
    (48, 48, 5, 1, 6, (2, 2)),
    (48, 88, 3, 2, 6, (1, 1)),
    (88, 88, 3, 1, 6, (1, 1)),
    (88, 88, 3, 1, 6, (1, 1)),
    (88, 88, 3, 1, 6, (1, 1)),
    (88, 120, 5, 1, 6, (2, 2)),
    (120, 120, 5, 1, 6, (2, 2)),
    (120, 120, 5, 1, 6, (2, 2)),
    (120, 120, 5, 1, 6, (2, 2)),
    (120, 208, 5, 2, 6, (2, 2)),
    (208, 208, 5, 1, 6, (2, 2)),
    (208, 208, 5, 1, 6, (2, 2)),
    (208, 208, 5, 1, 6, (2, 2)),
    (208, 208, 5, 1, 6, (2, 2)),
    (208, 352, 3, 1, 6, (1, 1)),
    (352, 352, 3, 1, 6, (1, 1)),
]


# ---------------------------------------------------------------------------
# Fused GEMM + BN-affine + activation kernel
# ---------------------------------------------------------------------------
def _plan_gemm_tiles(M, K, N):
    """Largest (bm, bn) that fit the VMEM budget; full-N tile preferred so the
    (large) activation operand is streamed exactly once across the N dimension."""
    def fits(bm, bn):
        byt = (2 * (bm * K + K * bn) * 2        # bf16 inputs, double buffered
               + 2 * bm * bn * 2                # bf16 output, double buffered
               + 3 * bm * bn * 4                # f32 matmul/epilogue temps
               + 4 * bn * 4)                    # scale / bias
        return byt <= GEMM_BUDGET

    bms = [c for c in (2048, 1024, 512, 256, 128) if c <= M] or [M]
    bns = [N] + [c for c in (1024, 512, 256, 128) if c < N]
    for bn in bns:
        for bm in bms:
            if fits(bm, bn):
                return bm, bn
    return bms[-1], bns[-1]


@functools.partial(jax.jit, static_argnames=("act",))
def matmul_affine(a, b, scale, bias, act="none"):
    """y = act((a @ b) * scale + bias); scale/bias broadcast along rows.

    bf16 MXU inputs, f32 math inside, bf16 output (no Cout padding, no slicing).
    """
    M, K = a.shape
    _, N = b.shape
    a = a.astype(jnp.bfloat16)
    b = b.astype(jnp.bfloat16)
    scale = scale.reshape(1, N).astype(jnp.float32)
    bias = bias.reshape(1, N).astype(jnp.float32)
    bm, bn = _plan_gemm_tiles(M, K, N)

    def kernel(a_ref, b_ref, s_ref, c_ref, o_ref):
        y = jnp.dot(a_ref[...], b_ref[...], preferred_element_type=jnp.float32)
        y = y * s_ref[...] + c_ref[...]
        if act == "relu":
            y = jnp.maximum(y, 0.0)
        elif act == "swish":
            y = y * jax.nn.sigmoid(y)
        elif act == "sigmoid":
            y = jax.nn.sigmoid(y)
        o_ref[...] = y.astype(o_ref.dtype)

    grid = (-(-M // bm), -(-N // bn))
    return pl.pallas_call(
        kernel,
        out_shape=jax.ShapeDtypeStruct((M, N), jnp.bfloat16),
        grid=grid,
        in_specs=[
            pl.BlockSpec((bm, K), lambda i, j: (i, 0)),
            pl.BlockSpec((K, bn), lambda i, j: (0, j)),
            pl.BlockSpec((1, bn), lambda i, j: (0, j)),
            pl.BlockSpec((1, bn), lambda i, j: (0, j)),
        ],
        out_specs=pl.BlockSpec((bm, bn), lambda i, j: (i, j)),
        compiler_params=pltpu.CompilerParams(
            dimension_semantics=("parallel", "parallel"),
            vmem_limit_bytes=VMEM_LIMIT),
    )(a, b, scale, bias)


# ---------------------------------------------------------------------------
# Final 1x1 conv to a single channel: plain channel reduction (no 128x padding).
# ---------------------------------------------------------------------------
@jax.jit
def conv1x1_to1(x, w, b):
    """x: (N,H,W,C) -> (N,H,W,1) f32; w: (1,C), b: (1,1)."""
    Nb, H, W, C = x.shape
    M = Nb * H * W
    bm = M if M < 2048 else 2048
    xm = x.reshape(M, C)

    def kernel(x_ref, w_ref, b_ref, o_ref):
        xv = x_ref[...].astype(jnp.float32)
        y = jnp.sum(xv * w_ref[...], axis=-1, keepdims=True) + b_ref[0, 0]
        o_ref[...] = y

    out = pl.pallas_call(
        kernel,
        out_shape=jax.ShapeDtypeStruct((M, 1), jnp.float32),
        grid=(-(-M // bm),),
        in_specs=[
            pl.BlockSpec((bm, C), lambda i: (i, 0)),
            pl.BlockSpec((1, C), lambda i: (0, 0)),
            pl.BlockSpec((1, 1), lambda i: (0, 0)),
        ],
        out_specs=pl.BlockSpec((bm, 1), lambda i: (i, 0)),
        compiler_params=pltpu.CompilerParams(
            dimension_semantics=("parallel",),
            vmem_limit_bytes=VMEM_LIMIT),
    )(xm, w.astype(jnp.float32), b.astype(jnp.float32))
    return out.reshape(Nb, H, W, 1)


# ---------------------------------------------------------------------------
# Depthwise kxk conv kernels (BN + swish fused), NHWC, bf16 in/out.
# ---------------------------------------------------------------------------
def _dw_tc(C):
    """Channel tile (lane dim): full C if small, else 128 (lane-dense)."""
    return C if C <= 128 else 128


def _pick_strip(Ho):
    """Output row-strip height that divides Ho (bounds VMEM, adds grid steps)."""
    for cand in (16, 8, 4, 2):
        if Ho % cand == 0:
            return cand
    return Ho


@functools.partial(jax.jit, static_argnames=("k", "pad"))
def depthwise_s1(x, w, scale, bias, k, pad):
    """Depthwise kxk conv (stride 1) + folded BN + swish, NHWC, bf16 out."""
    xp = jnp.pad(x.astype(jnp.bfloat16), ((0, 0), pad, pad, (0, 0)))
    Nb, Hp, Wp, C = xp.shape
    Ho, Wo = Hp - k + 1, Wp - k + 1
    tc = _dw_tc(C)
    nc = -(-C // tc)
    SH = _pick_strip(Ho)
    ns = Ho // SH

    def kernel(x_ref, w_ref, s_ref, b_ref, o_ref):
        row0 = pl.program_id(2) * SH
        xv = x_ref[:, pl.ds(row0, SH + k - 1), :, :].astype(jnp.float32)
        wv = w_ref[...]                                  # (k*k, tc)
        acc = jnp.zeros((1, SH, Wo, tc), jnp.float32)
        for dy in range(k):
            for dx in range(k):
                i = dy * k + dx
                tap = wv[i:i + 1, :].reshape(1, 1, 1, tc)
                acc = acc + xv[:, dy:dy + SH, dx:dx + Wo, :] * tap
        y = acc * s_ref[...].reshape(1, 1, 1, tc) + b_ref[...].reshape(1, 1, 1, tc)
        o_ref[...] = (y * jax.nn.sigmoid(y)).astype(o_ref.dtype)   # swish

    return pl.pallas_call(
        kernel,
        out_shape=jax.ShapeDtypeStruct((Nb, Ho, Wo, C), jnp.bfloat16),
        grid=(Nb, nc, ns),
        in_specs=[
            pl.BlockSpec((1, Hp, Wp, tc), lambda n, c, s: (n, 0, 0, c)),
            pl.BlockSpec((k * k, tc), lambda n, c, s: (0, c)),
            pl.BlockSpec((1, tc), lambda n, c, s: (0, c)),
            pl.BlockSpec((1, tc), lambda n, c, s: (0, c)),
        ],
        out_specs=pl.BlockSpec((1, SH, Wo, tc), lambda n, c, s: (n, s, 0, c)),
        compiler_params=pltpu.CompilerParams(
            dimension_semantics=("parallel", "parallel", "arbitrary"),
            vmem_limit_bytes=VMEM_LIMIT),
    )(xp, w, scale.reshape(1, C).astype(jnp.float32),
      bias.reshape(1, C).astype(jnp.float32))


@functools.partial(jax.jit, static_argnames=("k", "pad"))
def depthwise_s2(x, w, scale, bias, k, pad):
    """Depthwise kxk conv with stride 2 + folded BN + swish (bf16 out).

    Only the strided output positions are computed: the padded input is split
    in JAX (in bf16) into its 4 even/odd (row, col) phases, so the kernel needs
    only unit-stride slices and does 1/4 of the stride-1 VPU work.
    """
    xp = jnp.pad(x.astype(jnp.bfloat16), ((0, 0), pad, pad, (0, 0)))
    Nb, Hp, Wp, C = xp.shape
    Ho = (Hp - k) // 2 + 1
    Wo = (Wp - k) // 2 + 1
    q = (k - 1) // 2
    hph = Ho + q
    wph = Wo + q
    phases = []
    for py in range(2):
        for px in range(2):
            ph = xp[:, py::2, px::2, :][:, :hph, :wph, :]
            dh, dw = hph - ph.shape[1], wph - ph.shape[2]
            if dh or dw:                         # pad rows/cols never read by taps
                ph = jnp.pad(ph, ((0, 0), (0, dh), (0, dw), (0, 0)))
            phases.append(ph)
    xph = jnp.stack(phases, axis=1).reshape(Nb * 4, hph, wph, C)   # bf16
    tc = _dw_tc(C)
    nc = -(-C // tc)
    SH = _pick_strip(Ho)
    ns = Ho // SH

    def kernel(x_ref, w_ref, s_ref, b_ref, o_ref):
        row0 = pl.program_id(2) * SH
        xv = x_ref[:, pl.ds(row0, SH + q), :, :].astype(jnp.float32)  # (4,SH+q,wph,tc)
        wv = w_ref[...]                                               # (k*k, tc)
        acc = jnp.zeros((1, SH, Wo, tc), jnp.float32)
        for dy in range(k):
            for dx in range(k):
                p = (dy % 2) * 2 + (dx % 2)
                oy, ox = dy // 2, dx // 2
                i = dy * k + dx
                tap = wv[i:i + 1, :].reshape(1, 1, 1, tc)
                acc = acc + xv[p:p + 1, oy:oy + SH, ox:ox + Wo, :] * tap
        y = acc * s_ref[...].reshape(1, 1, 1, tc) + b_ref[...].reshape(1, 1, 1, tc)
        o_ref[...] = (y * jax.nn.sigmoid(y)).astype(o_ref.dtype)      # swish

    return pl.pallas_call(
        kernel,
        out_shape=jax.ShapeDtypeStruct((Nb, Ho, Wo, C), jnp.bfloat16),
        grid=(Nb, nc, ns),
        in_specs=[
            pl.BlockSpec((4, hph, wph, tc), lambda n, c, s: (n, 0, 0, c)),
            pl.BlockSpec((k * k, tc), lambda n, c, s: (0, c)),
            pl.BlockSpec((1, tc), lambda n, c, s: (0, c)),
            pl.BlockSpec((1, tc), lambda n, c, s: (0, c)),
        ],
        out_specs=pl.BlockSpec((1, SH, Wo, tc), lambda n, c, s: (n, s, 0, c)),
        compiler_params=pltpu.CompilerParams(
            dimension_semantics=("parallel", "parallel", "arbitrary"),
            vmem_limit_bytes=VMEM_LIMIT),
    )(xph, w, scale.reshape(1, C).astype(jnp.float32),
      bias.reshape(1, C).astype(jnp.float32))


# ---------------------------------------------------------------------------
# Bilinear x2 upsample (align_corners=True) without any HBM transposes.
# ---------------------------------------------------------------------------
def _upsample_matrix(n_in, n_out):
    """Row-interpolation matrix matching torch bilinear align_corners=True."""
    if n_in == 1:
        return jnp.ones((n_out, 1), jnp.float32)
    src = np.arange(n_out) * (n_in - 1) / (n_out - 1)
    i0 = np.clip(np.floor(src).astype(np.int64), 0, n_in - 1)
    i1 = np.minimum(i0 + 1, n_in - 1)
    frac = (src - i0).astype(np.float32)
    M = np.zeros((n_out, n_in), np.float32)
    M[np.arange(n_out), i0] += 1.0 - frac
    M[np.arange(n_out), i1] += frac
    return jnp.asarray(M)


@jax.jit
def bilinear_up2(x):
    """nn.Upsample(scale_factor=2, mode='bilinear', align_corners=True), NHWC."""
    N, H, W, C = x.shape
    Mh = _upsample_matrix(H, 2 * H)                      # (2H, H) f32
    Mw = _upsample_matrix(W, 2 * W)                      # (2W, W) f32

    # Pass 1: H interpolation, per-batch GEMM on the natural (H, W*C) view.
    x1 = x.reshape(N, H, W * C)

    def hk(m_ref, x_ref, o_ref):
        xv = x_ref[0].astype(jnp.float32)                # (H, W*C)
        o_ref[0] = jnp.dot(m_ref[...], xv,
                           preferred_element_type=jnp.float32).astype(o_ref.dtype)

    y1 = pl.pallas_call(
        hk,
        out_shape=jax.ShapeDtypeStruct((N, 2 * H, W * C), x.dtype),
        grid=(N,),
        in_specs=[pl.BlockSpec((2 * H, H), lambda n: (0, 0)),
                  pl.BlockSpec((1, H, W * C), lambda n: (n, 0, 0))],
        out_specs=pl.BlockSpec((1, 2 * H, W * C), lambda n: (n, 0, 0)),
        compiler_params=pltpu.CompilerParams(
            dimension_semantics=("parallel",), vmem_limit_bytes=VMEM_LIMIT),
    )(Mh, x1)

    # Pass 2: W interpolation, per-row GEMM on the natural (W, C) view.
    rows = N * 2 * H
    R = 8
    while rows % R:
        R //= 2
    y1 = y1.reshape(rows, W, C)

    def wk(m_ref, x_ref, o_ref):
        mv = m_ref[...]
        for r in range(R):
            xv = x_ref[r].astype(jnp.float32)            # (W, C)
            o_ref[r] = jnp.dot(mv, xv,
                               preferred_element_type=jnp.float32).astype(o_ref.dtype)

    y2 = pl.pallas_call(
        wk,
        out_shape=jax.ShapeDtypeStruct((rows, 2 * W, C), x.dtype),
        grid=(rows // R,),
        in_specs=[pl.BlockSpec((2 * W, W), lambda i: (0, 0)),
                  pl.BlockSpec((R, W, C), lambda i: (i, 0, 0))],
        out_specs=pl.BlockSpec((R, 2 * W, C), lambda i: (i, 0, 0)),
        compiler_params=pltpu.CompilerParams(
            dimension_semantics=("parallel",), vmem_limit_bytes=VMEM_LIMIT),
    )(Mw, y1)
    return y2.reshape(N, 2 * H, 2 * W, C)


# ---------------------------------------------------------------------------
# JAX glue around the kernels
# ---------------------------------------------------------------------------
@functools.partial(jax.jit, static_argnames=("act", "stride", "pad"))
def conv2d_affine_act(x, w, scale, bias, act, stride=1, pad=((0, 0), (0, 0))):
    """NHWC conv via im2col + fused Pallas GEMM. w is (kh, kw, Cin, Cout)."""
    N, H, W, C = x.shape
    kh, kw, _, Cout = w.shape
    x = x.astype(jnp.bfloat16)
    xp = jnp.pad(x, ((0, 0), pad[0], pad[1], (0, 0)))
    Hp, Wp = xp.shape[1], xp.shape[2]
    Ho = (Hp - kh) // stride + 1
    Wo = (Wp - kw) // stride + 1
    if kh == 1 and kw == 1 and stride == 1:
        A = xp.reshape(N * Ho * Wo, C)
    else:
        # TODO(synk): move im2col inside the Pallas kernel (halo windows) to avoid
        # the kh*kw-fold HBM materialization for 3x3 convs.
        cols = []
        for dy in range(kh):
            for dx in range(kw):
                cols.append(xp[:, dy:dy + (Ho - 1) * stride + 1:stride,
                               dx:dx + (Wo - 1) * stride + 1:stride, :])
        A = jnp.concatenate(cols, axis=-1).reshape(N * Ho * Wo, kh * kw * C)
    B = w.astype(jnp.bfloat16).reshape(kh * kw * C, Cout)
    y = matmul_affine(A, B, scale, bias, act=act)
    return y.reshape(N, Ho, Wo, Cout)


def bn_fold(bn, eps, conv_bias=None):
    s = bn["gamma"] / jnp.sqrt(bn["var"] + eps)
    b = bn["beta"] - bn["mean"] * s
    if conv_bias is not None:
        b = b + conv_bias * s
    return s, b


def mbconv(x, bp, cfg):
    cin, cout, k, stride, expand, pad = cfg
    inp = x
    if expand != 1:
        s, b = bn_fold(bp["bn0"], EFF_BN_EPS)
        x = conv2d_affine_act(x, bp["expand_w"], s, b, "swish")
    s, b = bn_fold(bp["bn1"], EFF_BN_EPS)
    if stride == 2:
        x = depthwise_s2(x, bp["dw_w"], s, b, k, pad)
    else:
        x = depthwise_s1(x, bp["dw_w"], s, b, k, pad)
    # Squeeze-and-excitation: tiny FCs (M = batch) in plain f32 JAX; the channel
    # gate is fused with the bf16 cast so the projection GEMM reads one pre-gated
    # bf16 tensor (no extra f32 pass over the widest activation).
    se = jnp.mean(x.astype(jnp.float32), axis=(1, 2))            # (N, Cexp)
    se = se @ bp["se_r_w"] + bp["se_r_b"]
    se = se * jax.nn.sigmoid(se)                                 # swish
    se = jax.nn.sigmoid(se @ bp["se_e_w"] + bp["se_e_b"])
    x = (x.astype(jnp.float32) * se[:, None, None, :]).astype(jnp.bfloat16)
    s, b = bn_fold(bp["bn2"], EFF_BN_EPS)
    x = conv2d_affine_act(x, bp["proj_w"], s, b, "none")
    if stride == 1 and cin == cout:
        x = x + inp                     # identity skip (eval: no drop_connect)
    return x


def double_conv_apply(x, p):
    s, b = bn_fold(p["bn1"], DEC_BN_EPS, conv_bias=p["b1"])
    x = conv2d_affine_act(x, p["w1"], s, b, "relu", pad=((1, 1), (1, 1)))
    s, b = bn_fold(p["bn2"], DEC_BN_EPS, conv_bias=p["b2"])
    x = conv2d_affine_act(x, p["w2"], s, b, "relu", pad=((1, 1), (1, 1)))
    return x


def up_apply(x1, x2, p):
    x1 = bilinear_up2(x1)
    dy = x2.shape[1] - x1.shape[1]
    dx = x2.shape[2] - x1.shape[2]
    if dy or dx:
        x1 = jnp.pad(x1, ((0, 0), (dy // 2, dy - dy // 2),
                          (dx // 2, dx - dx // 2), (0, 0)))
    x = jnp.concatenate([x2.astype(x1.dtype), x1], axis=-1)   # torch.cat([x2,x1],1)
    return double_conv_apply(x, p)


def eff_unet_b2_forward(P, inputs_nchw):
    x_in = jnp.transpose(inputs_nchw, (0, 2, 3, 1)).astype(jnp.float32)  # NHWC
    # stem: Conv2dStaticSamePadding k3 s2 (pad (0,1)) -> bn0.
    # NOTE: the module's forward applies only _conv_stem + _bn0 (no swish).
    s, b = bn_fold(P["stem_bn"], EFF_BN_EPS)
    x0 = conv2d_affine_act(x_in, P["stem_w"], s, b, "none",
                           stride=2, pad=((0, 1), (0, 1)))
    xs = [x0]
    for cfg, bp in zip(BLOCK_CFG, P["blocks"]):
        xs.append(mbconv(xs[-1], bp, cfg))
    y = up_apply(xs[23], xs[16], P["up1"])
    y = up_apply(y, xs[8], P["up2"])
    y = up_apply(y, xs[5], P["up3"])
    y = up_apply(y, xs[2], P["up4"])
    y = up_apply(y, x_in, P["up5"])
    y = conv1x1_to1(y, P["last_w"].reshape(1, -1), P["last_b"].reshape(1, 1))
    return jnp.transpose(y, (0, 3, 1, 2))       # back to NCHW, f32


# ---------------------------------------------------------------------------
# Deterministic synthetic parameters (shapes follow the module's __init__).
# ---------------------------------------------------------------------------
class ParamGen:
    def __init__(self, seed=0):
        self.rng = np.random.RandomState(seed)

    def normal(self, shape, std=1.0):
        return jnp.asarray(self.rng.normal(0.0, std, size=shape).astype(np.float32))

    def conv(self, shape):
        fan_in = int(np.prod(shape[:-1]))
        return self.normal(shape, std=1.0 / np.sqrt(fan_in))


def bn_params(pg, c):
    return dict(gamma=1.0 + 0.05 * pg.normal((c,)),
                beta=0.05 * pg.normal((c,)),
                mean=0.05 * pg.normal((c,)),
                var=1.0 + 0.05 * jnp.abs(pg.normal((c,))))


def make_params(seed=0):
    pg = ParamGen(seed)
    P = {"stem_w": pg.conv((3, 3, 3, 32)), "stem_bn": bn_params(pg, 32)}
    blocks = []
    for (cin, cout, k, stride, expand, pad) in BLOCK_CFG:
        cexp = cin * expand
        cse = max(1, cin // 4)
        bp = {}
        if expand != 1:
            bp["expand_w"] = pg.conv((1, 1, cin, cexp))
            bp["bn0"] = bn_params(pg, cexp)
        bp["dw_w"] = pg.normal((k * k, cexp), std=1.0 / k)
        bp["bn1"] = bn_params(pg, cexp)
        bp["se_r_w"] = pg.normal((cexp, cse), std=1.0 / np.sqrt(cexp))
        bp["se_r_b"] = pg.normal((cse,), std=0.01)
        bp["se_e_w"] = pg.normal((cse, cexp), std=1.0 / np.sqrt(cse))
        bp["se_e_b"] = pg.normal((cexp,), std=0.01)
        bp["proj_w"] = pg.conv((1, 1, cexp, cout))
        bp["bn2"] = bn_params(pg, cout)
        blocks.append(bp)
    P["blocks"] = blocks

    def dc(cin, cout):
        return dict(w1=pg.conv((3, 3, cin, cout)), b1=pg.normal((cout,), std=0.01),
                    bn1=bn_params(pg, cout),
                    w2=pg.conv((3, 3, cout, cout)), b2=pg.normal((cout,), std=0.01),
                    bn2=bn_params(pg, cout))

    P["up1"] = dc(472, 48)
    P["up2"] = dc(96, 24)
    P["up3"] = dc(48, 16)
    P["up4"] = dc(32, 16)
    P["up5"] = dc(19, 16)
    P["last_w"] = pg.conv((1, 1, 16, 1))
    P["last_b"] = pg.normal((1,), std=0.01)
    return P


if __name__ == "__main__":
    params = make_params(seed=0)
    key = jax.random.PRNGKey(0)
    # 64x64 is the smallest spatial size that survives the 32x encoder
    # downsampling (deepest feature map 2x2).
    inputs = jax.random.normal(key, (2, 3, 64, 64), dtype=jnp.float32)  # NCHW
    out = eff_unet_b2_forward(params, inputs)
    out = jax.block_until_ready(out)
    assert out.shape == (2, 1, 64, 64), out.shape
    assert bool(jnp.all(jnp.isfinite(out)))
    print("KERNEL_OK")
</pallas_src>

<mosaic_0001>
module attributes {stable_mosaic.version = 11 : i64} {
  func.func @kernel(%arg0: i32, %arg1: i32, %arg2: memref<2048x27xbf16, #tpu.memory_space<vmem>>, %arg3: memref<27x32xbf16, #tpu.memory_space<vmem>>, %arg4: memref<1x32xf32, #tpu.memory_space<vmem>>, %arg5: memref<1x32xf32, #tpu.memory_space<vmem>>, %arg6: memref<2048x32xbf16, #tpu.memory_space<vmem>>) attributes {dimension_semantics = [#tpu.dimension_semantics<parallel>, #tpu.dimension_semantics<parallel>], iteration_bounds = array<i64: 1, 1>, scalar_prefetch = 0 : i64, scratch_operands = 0 : i64, tpu.core_type = #tpu.core_type<tc>, window_params = [{transform_indices = @transform_0, window_bounds = array<i64: 2048, 27>}, {transform_indices = @transform_1, window_bounds = array<i64: 27, 32>}, {transform_indices = @transform_2, window_bounds = array<i64: 1, 32>}, {transform_indices = @transform_3, window_bounds = array<i64: 1, 32>}, {transform_indices = @transform_4, window_bounds = array<i64: 2048, 32>}]} {
    %c0 = arith.constant 0 : index
    %c0_0 = arith.constant 0 : index
    %0 = vector.load %arg2[%c0, %c0_0] : memref<2048x27xbf16, #tpu.memory_space<vmem>>, vector<2048x27xbf16>
    %c0_1 = arith.constant 0 : index
    %c0_2 = arith.constant 0 : index
    %1 = vector.load %arg3[%c0_1, %c0_2] : memref<27x32xbf16, #tpu.memory_space<vmem>>, vector<27x32xbf16>
    %cst = arith.constant dense<0.000000e+00> : vector<2048x32xf32>
    %2 = tpu.matmul %0, %1, %cst {dimension_numbers = #tpu.dot_dimension_numbers<[1], [0], [0], [1], [0, 0, 1, 1], [], []>} : vector<2048x27xbf16>, vector<27x32xbf16>, vector<2048x32xf32> -> vector<2048x32xf32>
    %c0_3 = arith.constant 0 : index
    %c0_4 = arith.constant 0 : index
    %3 = vector.load %arg4[%c0_3, %c0_4] : memref<1x32xf32, #tpu.memory_space<vmem>>, vector<1x32xf32>
    %4 = vector.broadcast %3 : vector<1x32xf32> to vector<2048x32xf32>
    %5 = arith.mulf %2, %4 : vector<2048x32xf32>
    %c0_5 = arith.constant 0 : index
    %c0_6 = arith.constant 0 : index
    %6 = vector.load %arg5[%c0_5, %c0_6] : memref<1x32xf32, #tpu.memory_space<vmem>>, vector<1x32xf32>
    %7 = vector.broadcast %6 : vector<1x32xf32> to vector<2048x32xf32>
    %8 = arith.addf %5, %7 : vector<2048x32xf32>
    %9 = arith.truncf %8 : vector<2048x32xf32> to vector<2048x32xbf16>
    %c0_7 = arith.constant 0 : index
    %c0_8 = arith.constant 0 : index
    %10 = vector.load %arg6[%c0_7, %c0_8] : memref<2048x32xbf16, #tpu.memory_space<vmem>>, vector<2048x32xbf16>
    tpu.vector_store %arg6[%c0_7, %c0_8], %9 {strides = array<i32>} : memref<2048x32xbf16, #tpu.memory_space<vmem>>, vector<2048x32xbf16>,
    return
  }
  func.func @transform_0(%arg0: i32, %arg1: i32) -> (i32, i32) {
    %c0_i32 = arith.constant 0 : i32
    %c0_i32_0 = arith.constant 0 : i32
    return %arg0, %c0_i32 : i32, i32
  }
  func.func @transform_1(%arg0: i32, %arg1: i32) -> (i32, i32) {
    %c0_i32 = arith.constant 0 : i32
    %c0_i32_0 = arith.constant 0 : i32
    return %c0_i32, %arg1 : i32, i32
  }
  func.func @transform_2(%arg0: i32, %arg1: i32) -> (i32, i32) {
    %c0_i32 = arith.constant 0 : i32
    %c0_i32_0 = arith.constant 0 : i32
    return %c0_i32, %arg1 : i32, i32
  }
  func.func @transform_3(%arg0: i32, %arg1: i32) -> (i32, i32) {
    %c0_i32 = arith.constant 0 : i32
    %c0_i32_0 = arith.constant 0 : i32
    return %c0_i32, %arg1 : i32, i32
  }
  func.func @transform_4(%arg0: i32, %arg1: i32) -> (i32, i32) {
    %c0_i32 = arith.constant 0 : i32
    return %arg0, %arg1 : i32, i32
  }
}

</mosaic_0001>

<bundles_post_ra>
// kernel: matmul_affine.1
= control target key start
LH: loop header
LB: loop body
LE: loop exit
PB: predicated region body
PF: predicated region fallthrough
CT: control target
= control target key end

     0   :  { %vm1314_vm0 = vcmask 1044480   ;;  %vm1315_vm1 = vcmask 1045504   ;;  %vm929_vm2 = vcmask 220160   ;;  %v5490_v1 = vmov 65535   ;;  %s7600_s1 = inlined_call_operand.vmem [shape: bf16[27,32], index: 1, kind: input, shape index: {}]   ;;  %s7601_s0 = inlined_call_operand.vmem [shape: bf16[2048,27], index: 0, kind: input, shape index: {}]   ;;  %s7602_s2 = inlined_call_operand.vmem [shape: f32[1,32], index: 2, kind: input, shape index: {}]   ;;  %s7603_s3 = inlined_call_operand.vmem [shape: f32[1,32], index: 3, kind: input, shape index: {}]   ;;  %s7604_s4 = inlined_call_operand.vmem [shape: bf16[2048,32], index: 4, kind: output, shape index: {}]  }
   0x1   :  { %v5356_v0 = vld [vmem:[%s7600_s1] sm:$0xff]   ;;  %v1316_v2 = vsel %vm1314_vm0, 4294967295, %v5490_v1  ;;  %v5357_v3 = vld [vmem:[%s7600_s1 + $0x8] sm:$0x3f]   ;;  %v5362_v10 = vld [vmem:[%s7601_s0 + $0x10] sm:$0xff]   ;;  %vm3928_vm3 = vcmask 257024  }
   0x2   :  { %5091 = vmatprep.subr.bf16.mxu0 %v5356_v0  ;;  %5351 = vmatprep.subr.bf16.mxu1 %v5356_v0  ;;  %v1317_v4 = vsel %vm1315_vm1, %v1316_v2, 0  ;;  %v5358_v5 = vld [vmem:[%s7601_s0] sm:$0xff]   ;;  %v5360_v8 = vld [vmem:[%s7601_s0 + $0x8] sm:$0xff]   ;;  %v5363_v11 = vld [vmem:[%s7601_s0 + $0x210] sm:$0xff]  }
   0x3   :  { %5092 = vmatpush3.bf16.msra.mxu0 %v5356_v0  ;;  %5353 = vmatpush3.bf16.msra.mxu1 %v5356_v0  ;;  %v1319_v6 = vand.u32 %v5357_v3, %v1317_v4  ;;  %v5359_v7 = vld [vmem:[%s7601_s0 + $0x200] sm:$0xff]   ;;  %v5361_v9 = vld [vmem:[%s7601_s0 + $0x208] sm:$0xff]   ;;  %v5364_v12 = vld [vmem:[%s7601_s0 + $0x18] sm:$0xff]  }
   0x4   :  { %5095 = vmatprep.mubr.msk.bf16.mxu0 %vm929_vm2, %v5358_v5  ;;  %5223 = vmatprep.mubr.msk.bf16.mxu1 %vm929_vm2, %v5359_v7  ;;  %v5365_v13 = vld [vmem:[%s7601_s0 + $0x218] sm:$0xff]   ;;  %v5366_v14 = vld [vmem:[%s7601_s0 + $0x20] sm:$0xff]   ;;  %v5368_v16 = vld [vmem:[%s7601_s0 + $0x28] sm:$0xff]  }
   0x5   :  { %5093 = vmatprep.subr.bf16.mxu0 %v1319_v6  ;;  %5352 = vmatprep.subr.bf16.mxu1 %v1319_v6  ;;  %v5367_v15 = vld [vmem:[%s7601_s0 + $0x220] sm:$0xff]   ;;  %v5369_v17 = vld [vmem:[%s7601_s0 + $0x228] sm:$0xff]   ;;  %v5370_v18 = vld [vmem:[%s7601_s0 + $0x30] sm:$0xff]  }
   0x6   :  { %v5371_v19 = vld [vmem:[%s7601_s0 + $0x230] sm:$0xff]   ;;  %v5372_v20 = vld [vmem:[%s7601_s0 + $0x38] sm:$0xff]   ;;  %v5374_v22 = vld [vmem:[%s7601_s0 + $0x40] sm:$0xff]  }
   0x7   :  { %5094 = vmatpush3.bf16.msra.mxu0 %v1319_v6  ;;  %5354 = vmatpush3.bf16.msra.mxu1 %v1319_v6  ;;  %v5373_v21 = vld [vmem:[%s7601_s0 + $0x238] sm:$0xff]   ;;  %v5375_v23 = vld [vmem:[%s7601_s0 + $0x240] sm:$0xff]   ;;  %v5376_v24 = vld [vmem:[%s7601_s0 + $0x48] sm:$0xff]  }
   0x8   :  { %v5377_v25 = vld [vmem:[%s7601_s0 + $0x248] sm:$0xff]   ;;  %v5378_v26 = vld [vmem:[%s7601_s0 + $0x50] sm:$0xff]   ;;  %v5380_v28 = vld [vmem:[%s7601_s0 + $0x58] sm:$0xff]  }
   0x9   :  { %v5379_v27 = vld [vmem:[%s7601_s0 + $0x250] sm:$0xff]   ;;  %v5381_v29 = vld [vmem:[%s7601_s0 + $0x258] sm:$0xff]   ;;  %v5382_v30 = vld [vmem:[%s7601_s0 + $0x60] sm:$0xff]  }
   0xa   :  { %5096 = vmatmul.mubr.msk.bf16.vlgmr.msra.gmra.mrb[0].mxu0 %vm929_vm2, %v5360_v8  ;;  %5224 = vmatmul.mubr.msk.bf16.vlgmr.msra.gmra.mrb[0].mxu1 %vm929_vm2, %v5361_v9  ;;  %v5383_v31 = vld [vmem:[%s7601_s0 + $0x260] sm:$0xff]   ;;  %v5384_v32 = vld [vmem:[%s7601_s0 + $0x68] sm:$0xff]   ;;  %v5386_v34 = vld [vmem:[%s7601_s0 + $0x70] sm:$0xff]  }
   0xb   :  { %5099 = vmatprep.mubr.msk.bf16.mxu0 %vm929_vm2, %v5362_v10  ;;  %5227 = vmatprep.mubr.msk.bf16.mxu1 %vm929_vm2, %v5363_v11  ;;  %v5385_v33 = vld [vmem:[%s7601_s0 + $0x268] sm:$0xff]   ;;  %v5387_v35 = vld [vmem:[%s7601_s0 + $0x270] sm:$0xff]   ;;  %v5388_v36 = vld [vmem:[%s7601_s0 + $0x78] sm:$0xff]  }
   0xc   :  { %v5389_v37 = vld [vmem:[%s7601_s0 + $0x278] sm:$0xff]   ;;  %v5390_v38 = vld [vmem:[%s7601_s0 + $0x80] sm:$0xff]   ;;  %v5392_v40 = vld [vmem:[%s7601_s0 + $0x88] sm:$0xff]  }
   0xd   :  { %v5391_v39 = vld [vmem:[%s7601_s0 + $0x280] sm:$0xff]   ;;  %v5393_v41 = vld [vmem:[%s7601_s0 + $0x288] sm:$0xff]   ;;  %v5394_v42 = vld [vmem:[%s7601_s0 + $0x90] sm:$0xff]  }
   0xe   :  { %v5395_v43 = vld [vmem:[%s7601_s0 + $0x290] sm:$0xff]   ;;  %v5396_v44 = vld [vmem:[%s7601_s0 + $0x98] sm:$0xff]   ;;  %v5398_v46 = vld [vmem:[%s7601_s0 + $0xa0] sm:$0xff]  }
   0xf   :  { %v5397_v45 = vld [vmem:[%s7601_s0 + $0x298] sm:$0xff]   ;;  %v5399_v47 = vld [vmem:[%s7601_s0 + $0x2a0] sm:$0xff]   ;;  %v5400_v48 = vld [vmem:[%s7601_s0 + $0xa8] sm:$0xff]  }
  0x10   :  { %v5401_v49 = vld [vmem:[%s7601_s0 + $0x2a8] sm:$0xff]   ;;  %v5402_v50 = vld [vmem:[%s7601_s0 + $0xb0] sm:$0xff]   ;;  %v5404_v52 = vld [vmem:[%s7601_s0 + $0xb8] sm:$0xff]  }
  0x11   :  { %v5403_v51 = vld [vmem:[%s7601_s0 + $0x2b0] sm:$0xff]   ;;  %v5405_v53 = vld [vmem:[%s7601_s0 + $0x2b8] sm:$0xff]   ;;  %v5406_v54 = vld [vmem:[%s7601_s0 + $0xc0] sm:$0xff]  }
  0x12   :  { %5100 = vmatmul.mubr.msk.bf16.gmra.mrb[4].mxu0 %vm929_vm2, %v5364_v12  ;;  %5228 = vmatmul.mubr.msk.bf16.gmra.mrb[4].mxu1 %vm929_vm2, %v5365_v13  ;;  %v5407_v55 = vld [vmem:[%s7601_s0 + $0x2c0] sm:$0xff]   ;;  %v5408_v56 = vld [vmem:[%s7601_s0 + $0xc8] sm:$0xff]   ;;  %v5410_v58 = vld [vmem:[%s7601_s0 + $0xd0] sm:$0xff]  }
  0x13   :  { %5103 = vmatprep.mubr.msk.bf16.mxu0 %vm929_vm2, %v5366_v14  ;;  %5231 = vmatprep.mubr.msk.bf16.mxu1 %vm929_vm2, %v5367_v15  ;;  %v5409_v57 = vld [vmem:[%s7601_s0 + $0x2c8] sm:$0xff]   ;;  %v5411_v59 = vld [vmem:[%s7601_s0 + $0x2d0] sm:$0xff]   ;;  %v5412_v60 = vld [vmem:[%s7601_s0 + $0xd8] sm:$0xff]  }
  0x14   :  { %v5413_v61 = vld [vmem:[%s7601_s0 + $0x2d8] sm:$0xff]   ;;  %v5414_v62 = vld [vmem:[%s7601_s0 + $0xe0] sm:$0xff]   ;;  %v5416_v0 = vld [vmem:[%s7601_s0 + $0xe8] sm:$0xff]  }
  0x15   :  { %v5415_v63 = vld [vmem:[%s7601_s0 + $0x2e0] sm:$0xff]   ;;  %v5417_v1 = vld [vmem:[%s7601_s0 + $0x2e8] sm:$0xff]   ;;  %v5418_v2 = vld [vmem:[%s7601_s0 + $0xf0] sm:$0xff]  }
  0x16   :  { %v5419_v3 = vld [vmem:[%s7601_s0 + $0x2f0] sm:$0xff]   ;;  %v5420_v4 = vld [vmem:[%s7601_s0 + $0xf8] sm:$0xff]   ;;  %v5422_v6 = vld [vmem:[%s7601_s0 + $0x100] sm:$0xff]  }
  0x17   :  { %v5421_v5 = vld [vmem:[%s7601_s0 + $0x2f8] sm:$0xff]   ;;  %v5423_v7 = vld [vmem:[%s7601_s0 + $0x300] sm:$0xff]   ;;  %v5424_v8 = vld [vmem:[%s7601_s0 + $0x108] sm:$0xff]  }
  0x18   :  { %v5425_v9 = vld [vmem:[%s7601_s0 + $0x308] sm:$0xff]   ;;  %v5426_v10 = vld [vmem:[%s7601_s0 + $0x110] sm:$0xff]   ;;  %v5428_v12 = vld [vmem:[%s7601_s0 + $0x118] sm:$0xff]  }
  0x19   :  { %v5427_v11 = vld [vmem:[%s7601_s0 + $0x310] sm:$0xff]   ;;  %v5429_v13 = vld [vmem:[%s7601_s0 + $0x318] sm:$0xff]   ;;  %v5430_v14 = vld [vmem:[%s7601_s0 + $0x120] sm:$0xff]  }
  0x1a   :  { %5104 = vmatmul.mubr.msk.bf16.gmra.mrb[8].mxu0 %vm929_vm2, %v5368_v16  ;;  %5232 = vmatmul.mubr.msk.bf16.gmra.mrb[8].mxu1 %vm929_vm2, %v5369_v17  ;;  %v5431_v15 = vld [vmem:[%s7601_s0 + $0x320] sm:$0xff]   ;;  %v5432_v16 = vld [vmem:[%s7601_s0 + $0x128] sm:$0xff]  }
  0x1b   :  { %5107 = vmatprep.mubr.msk.bf16.mxu0 %vm929_vm2, %v5370_v18  ;;  %5235 = vmatprep.mubr.msk.bf16.mxu1 %vm929_vm2, %v5371_v19  ;;  %v5433_v17 = vld [vmem:[%s7601_s0 + $0x328] sm:$0xff]   ;;  %v5434_v18 = vld [vmem:[%s7601_s0 + $0x130] sm:$0xff]  }
  0x1c   :  { %v5435_v19 = vld [vmem:[%s7601_s0 + $0x330] sm:$0xff]  }
  0x22   :  { %5108 = vmatmul.mubr.msk.bf16.gmra.mrb[12].mxu0 %vm929_vm2, %v5372_v20  ;;  %5236 = vmatmul.mubr.msk.bf16.gmra.mrb[12].mxu1 %vm929_vm2, %v5373_v21  ;;  %v5436_v20 = vld [vmem:[%s7601_s0 + $0x138] sm:$0xff]  }
  0x23   :  { %5111 = vmatprep.mubr.msk.bf16.mxu0 %vm929_vm2, %v5374_v22  ;;  %5239 = vmatprep.mubr.msk.bf16.mxu1 %vm929_vm2, %v5375_v23  ;;  %v5437_v21 = vld [vmem:[%s7601_s0 + $0x338] sm:$0xff]   ;;  %v5438_v22 = vld [vmem:[%s7601_s0 + $0x140] sm:$0xff]  }
  0x24   :  { %v5439_v23 = vld [vmem:[%s7601_s0 + $0x340] sm:$0xff]  }
  0x2a   :  { %5112 = vmatmul.mubr.msk.bf16.gmra.mrb[16].mxu0 %vm929_vm2, %v5376_v24  ;;  %5240 = vmatmul.mubr.msk.bf16.gmra.mrb[16].mxu1 %vm929_vm2, %v5377_v25  ;;  %v5440_v24 = vld [vmem:[%s7601_s0 + $0x148] sm:$0xff]  }
  0x2b   :  { %5115 = vmatprep.mubr.msk.bf16.mxu0 %vm929_vm2, %v5378_v26  ;;  %5243 = vmatprep.mubr.msk.bf16.mxu1 %vm929_vm2, %v5379_v27  ;;  %v5441_v25 = vld [vmem:[%s7601_s0 + $0x348] sm:$0xff]   ;;  %v5442_v26 = vld [vmem:[%s7601_s0 + $0x150] sm:$0xff]  }
  0x2c   :  { %v5443_v27 = vld [vmem:[%s7601_s0 + $0x350] sm:$0xff]  }
  0x32   :  { %5116 = vmatmul.mubr.msk.bf16.gmra.mrb[20].mxu0 %vm929_vm2, %v5380_v28  ;;  %5244 = vmatmul.mubr.msk.bf16.gmra.mrb[20].mxu1 %vm929_vm2, %v5381_v29  ;;  %v5444_v28 = vld [vmem:[%s7601_s0 + $0x158] sm:$0xff]  }
  0x33   :  { %5119 = vmatprep.mubr.msk.bf16.mxu0 %vm929_vm2, %v5382_v30  ;;  %5247 = vmatprep.mubr.msk.bf16.mxu1 %vm929_vm2, %v5383_v31  ;;  %v5445_v29 = vld [vmem:[%s7601_s0 + $0x358] sm:$0xff]   ;;  %v5446_v30 = vld [vmem:[%s7601_s0 + $0x160] sm:$0xff]  }
  0x34   :  { %v5447_v31 = vld [vmem:[%s7601_s0 + $0x360] sm:$0xff]  }
  0x3a   :  { %5120 = vmatmul.mubr.msk.bf16.gmra.mrb[24].mxu0 %vm929_vm2, %v5384_v32  ;;  %5248 = vmatmul.mubr.msk.bf16.gmra.mrb[24].mxu1 %vm929_vm2, %v5385_v33  ;;  %v5448_v32 = vld [vmem:[%s7601_s0 + $0x168] sm:$0xff]  }
  0x3b   :  { %5123 = vmatprep.mubr.msk.bf16.mxu0 %vm929_vm2, %v5386_v34  ;;  %5251 = vmatprep.mubr.msk.bf16.mxu1 %vm929_vm2, %v5387_v35  ;;  %v5449_v33 = vld [vmem:[%s7601_s0 + $0x368] sm:$0xff]   ;;  %v5450_v34 = vld [vmem:[%s7601_s0 + $0x170] sm:$0xff]  }
  0x3c   :  { %v5451_v35 = vld [vmem:[%s7601_s0 + $0x370] sm:$0xff]  }
  0x42   :  { %5124 = vmatmul.mubr.msk.bf16.gmra.mrb[28].mxu0 %vm929_vm2, %v5388_v36  ;;  %5252 = vmatmul.mubr.msk.bf16.gmra.mrb[28].mxu1 %vm929_vm2, %v5389_v37  ;;  %v5452_v36 = vld [vmem:[%s7601_s0 + $0x178] sm:$0xff]  }
  0x43   :  { %5127 = vmatprep.mubr.msk.bf16.mxu0 %vm929_vm2, %v5390_v38  ;;  %5255 = vmatprep.mubr.msk.bf16.mxu1 %vm929_vm2, %v5391_v39  ;;  %v5453_v37 = vld [vmem:[%s7601_s0 + $0x378] sm:$0xff]   ;;  %v5454_v38 = vld [vmem:[%s7601_s0 + $0x180] sm:$0xff]  }
  0x44   :  { %v5455_v39 = vld [vmem:[%s7601_s0 + $0x380] sm:$0xff]  }
  0x4a   :  { %5128 = vmatmul.mubr.msk.bf16.gmra.mrb[32].mxu0 %vm929_vm2, %v5392_v40  ;;  %5256 = vmatmul.mubr.msk.bf16.gmra.mrb[32].mxu1 %vm929_vm2, %v5393_v41  ;;  %v5456_v40 = vld [vmem:[%s7601_s0 + $0x188] sm:$0xff]  }
  0x4b   :  { %5131 = vmatprep.mubr.msk.bf16.mxu0 %vm929_vm2, %v5394_v42  ;;  %5259 = vmatprep.mubr.msk.bf16.mxu1 %vm929_vm2, %v5395_v43  ;;  %v5457_v41 = vld [vmem:[%s7601_s0 + $0x388] sm:$0xff]   ;;  %v5458_v42 = vld [vmem:[%s7601_s0 + $0x190] sm:$0xff]  }
  0x4c   :  { %v5459_v43 = vld [vmem:[%s7601_s0 + $0x390] sm:$0xff]  }
  0x52   :  { %5132 = vmatmul.mubr.msk.bf16.gmra.mrb[36].mxu0 %vm929_vm2, %v5396_v44  ;;  %5260 = vmatmul.mubr.msk.bf16.gmra.mrb[36].mxu1 %vm929_vm2, %v5397_v45  ;;  %v5460_v44 = vld [vmem:[%s7601_s0 + $0x198] sm:$0xff]  }
  0x53   :  { %5135 = vmatprep.mubr.msk.bf16.mxu0 %vm929_vm2, %v5398_v46  ;;  %5263 = vmatprep.mubr.msk.bf16.mxu1 %vm929_vm2, %v5399_v47  ;;  %v5461_v45 = vld [vmem:[%s7601_s0 + $0x398] sm:$0xff]   ;;  %v5462_v46 = vld [vmem:[%s7601_s0 + $0x1a0] sm:$0xff]  }
  0x54   :  { %v5463_v47 = vld [vmem:[%s7601_s0 + $0x3a0] sm:$0xff]  }
  0x5a   :  { %5136 = vmatmul.mubr.msk.bf16.gmra.mrb[40].mxu0 %vm929_vm2, %v5400_v48  ;;  %5264 = vmatmul.mubr.msk.bf16.gmra.mrb[40].mxu1 %vm929_vm2, %v5401_v49  ;;  %v5464_v48 = vld [vmem:[%s7601_s0 + $0x1a8] sm:$0xff]  }
  0x5b   :  { %5139 = vmatprep.mubr.msk.bf16.mxu0 %vm929_vm2, %v5402_v50  ;;  %5267 = vmatprep.mubr.msk.bf16.mxu1 %vm929_vm2, %v5403_v51  ;;  %v5465_v49 = vld [vmem:[%s7601_s0 + $0x3a8] sm:$0xff]   ;;  %v5466_v50 = vld [vmem:[%s7601_s0 + $0x1b0] sm:$0xff]  }
  0x5c   :  { %v5467_v51 = vld [vmem:[%s7601_s0 + $0x3b0] sm:$0xff]  }
  0x62   :  { %5140 = vmatmul.mubr.msk.bf16.gmra.mrb[44].mxu0 %vm929_vm2, %v5404_v52  ;;  %5268 = vmatmul.mubr.msk.bf16.gmra.mrb[44].mxu1 %vm929_vm2, %v5405_v53  ;;  %v5963_v52 = vld [vmem:[%s7602_s2] ss:$0 sm:$0xff] }
  0x63   :  { %5143 = vmatprep.mubr.msk.bf16.mxu0 %vm929_vm2, %v5406_v54  ;;  %5271 = vmatprep.mubr.msk.bf16.mxu1 %vm929_vm2, %v5407_v55  ;;  %v5970_v54 = vld [vmem:[%s7603_s3] ss:$0 sm:$0xff] }
  0x6a   :  { %5144 = vmatmul.mubr.msk.bf16.gmra.mrb[48].mxu0 %vm929_vm2, %v5408_v56  ;;  %5272 = vmatmul.mubr.msk.bf16.gmra.mrb[48].mxu1 %vm929_vm2, %v5409_v57 }
  0x6b   :  { %5147 = vmatprep.mubr.msk.bf16.mxu0 %vm929_vm2, %v5410_v58  ;;  %5275 = vmatprep.mubr.msk.bf16.mxu1 %vm929_vm2, %v5411_v59 }
  0x72   :  { %5148 = vmatmul.mubr.msk.bf16.gmra.mrb[52].mxu0 %vm929_vm2, %v5412_v60  ;;  %5276 = vmatmul.mubr.msk.bf16.gmra.mrb[52].mxu1 %vm929_vm2, %v5413_v61  ;;  %v5468_v60 = vld [vmem:[%s7601_s0 + $0x1b8] sm:$0xff]  }
  0x73   :  { %5151 = vmatprep.mubr.msk.bf16.mxu0 %vm929_vm2, %v5414_v62  ;;  %5279 = vmatprep.mubr.msk.bf16.mxu1 %vm929_vm2, %v5415_v63 }
  0x7a   :  { %5152 = vmatmul.mubr.msk.bf16.gmra.mrb[56].mxu0 %vm929_vm2, %v5416_v0  ;;  %5280 = vmatmul.mubr.msk.bf16.gmra.mrb[56].mxu1 %vm929_vm2, %v5417_v1  ;;  %v5469_v1 = vld [vmem:[%s7601_s0 + $0x3b8] sm:$0xff]  }
  0x7b   :  { %5155 = vmatprep.mubr.msk.bf16.mxu0 %vm929_vm2, %v5418_v2  ;;  %5283 = vmatprep.mubr.msk.bf16.mxu1 %vm929_vm2, %v5419_v3 }
  0x82   :  { %5156 = vmatmul.mubr.msk.bf16.gmra.mrb[60].mxu0 %vm929_vm2, %v5420_v4  ;;  %5284 = vmatmul.mubr.msk.bf16.gmra.mrb[60].mxu1 %vm929_vm2, %v5421_v5 }
  0x83   :  { %5159 = vmatprep.mubr.msk.bf16.mxu0 %vm929_vm2, %v5422_v6  ;;  %5287 = vmatprep.mubr.msk.bf16.mxu1 %vm929_vm2, %v5423_v7 }
  0x8a   :  { %5160 = vmatmul.mubr.msk.bf16.gmra.mrb[64].mxu0 %vm929_vm2, %v5424_v8  ;;  %5288 = vmatmul.mubr.msk.bf16.gmra.mrb[64].mxu1 %vm929_vm2, %v5425_v9  ;;  %v5470_v8 = vld [vmem:[%s7601_s0 + $0x1c0] sm:$0xff]  }
  0x8b   :  { %5163 = vmatprep.mubr.msk.bf16.mxu0 %vm929_vm2, %v5426_v10  ;;  %5291 = vmatprep.mubr.msk.bf16.mxu1 %vm929_vm2, %v5427_v11  ;;  %v5471_v9 = vld [vmem:[%s7601_s0 + $0x3c0] sm:$0xff]  }
  0x92   :  { %5164 = vmatmul.mubr.msk.bf16.gmra.mrb[68].mxu0 %vm929_vm2, %v5428_v12  ;;  %5292 = vmatmul.mubr.msk.bf16.gmra.mrb[68].mxu1 %vm929_vm2, %v5429_v13 }
  0x93   :  { %5167 = vmatprep.mubr.msk.bf16.mxu0 %vm929_vm2, %v5430_v14  ;;  %5295 = vmatprep.mubr.msk.bf16.mxu1 %vm929_vm2, %v5431_v15 }
  0x9a   :  { %5168 = vmatmul.mubr.msk.bf16.gmra.mrb[72].mxu0 %vm929_vm2, %v5432_v16  ;;  %5296 = vmatmul.mubr.msk.bf16.gmra.mrb[72].mxu1 %vm929_vm2, %v5433_v17 }
  0x9b   :  { %5171 = vmatprep.mubr.msk.bf16.mxu0 %vm929_vm2, %v5434_v18  ;;  %5299 = vmatprep.mubr.msk.bf16.mxu1 %vm929_vm2, %v5435_v19 }
  0xa2   :  { %5172 = vmatmul.mubr.msk.bf16.gmra.mrb[76].mxu0 %vm929_vm2, %v5436_v20  ;;  %5300 = vmatmul.mubr.msk.bf16.gmra.mrb[76].mxu1 %vm929_vm2, %v5437_v21 }
  0xa3   :  { %5175 = vmatprep.mubr.msk.bf16.mxu0 %vm929_vm2, %v5438_v22  ;;  %5303 = vmatprep.mubr.msk.bf16.mxu1 %vm929_vm2, %v5439_v23 }
  0xaa   :  { %5176 = vmatmul.mubr.msk.bf16.gmra.mrb[80].mxu0 %vm929_vm2, %v5440_v24  ;;  %5304 = vmatmul.mubr.msk.bf16.gmra.mrb[80].mxu1 %vm929_vm2, %v5441_v25 }
  0xab   :  { %5179 = vmatprep.mubr.msk.bf16.mxu0 %vm929_vm2, %v5442_v26  ;;  %5307 = vmatprep.mubr.msk.bf16.mxu1 %vm929_vm2, %v5443_v27 }
  0xb2   :  { %5180 = vmatmul.mubr.msk.bf16.gmra.mrb[84].mxu0 %vm929_vm2, %v5444_v28  ;;  %5308 = vmatmul.mubr.msk.bf16.gmra.mrb[84].mxu1 %vm929_vm2, %v5445_v29 }
  0xb3   :  { %5183 = vmatprep.mubr.msk.bf16.mxu0 %vm929_vm2, %v5446_v30  ;;  %5311 = vmatprep.mubr.msk.bf16.mxu1 %vm929_vm2, %v5447_v31 }
  0xba   :  { %5184 = vmatmul.mubr.msk.bf16.gmra.mrb[88].mxu0 %vm929_vm2, %v5448_v32  ;;  %5312 = vmatmul.mubr.msk.bf16.gmra.mrb[88].mxu1 %vm929_vm2, %v5449_v33  ;;  %v5472_v32 = vld [vmem:[%s7601_s0 + $0x1c8] sm:$0xff]  }
  0xbb   :  { %5187 = vmatprep.mubr.msk.bf16.mxu0 %vm929_vm2, %v5450_v34  ;;  %5315 = vmatprep.mubr.msk.bf16.mxu1 %vm929_vm2, %v5451_v35 }
  0xc2   :  { %5188 = vmatmul.mubr.msk.bf16.gmra.mrb[92].mxu0 %vm929_vm2, %v5452_v36  ;;  %5316 = vmatmul.mubr.msk.bf16.gmra.mrb[92].mxu1 %vm929_vm2, %v5453_v37  ;;  %v5473_v37 = vld [vmem:[%s7601_s0 + $0x3c8] sm:$0xff]  }
  0xc3   :  { %5191 = vmatprep.mubr.msk.bf16.mxu0 %vm929_vm2, %v5454_v38  ;;  %5319 = vmatprep.mubr.msk.bf16.mxu1 %vm929_vm2, %v5455_v39 }
  0xca   :  { %5192 = vmatmul.mubr.msk.bf16.gmra.mrb[96].mxu0 %vm929_vm2, %v5456_v40  ;;  %5320 = vmatmul.mubr.msk.bf16.gmra.mrb[96].mxu1 %vm929_vm2, %v5457_v41 }
  0xcb   :  { %5195 = vmatprep.mubr.msk.bf16.mxu0 %vm929_vm2, %v5458_v42  ;;  %5323 = vmatprep.mubr.msk.bf16.mxu1 %vm929_vm2, %v5459_v43 }
  0xd2   :  { %5196 = vmatmul.mubr.msk.bf16.gmra.mrb[100].mxu0 %vm929_vm2, %v5460_v44  ;;  %5324 = vmatmul.mubr.msk.bf16.gmra.mrb[100].mxu1 %vm929_vm2, %v5461_v45  ;;  %v5474_v44 = vld [vmem:[%s7601_s0 + $0x1d0] sm:$0xff]  }
  0xd3   :  { %5199 = vmatprep.mubr.msk.bf16.mxu0 %vm929_vm2, %v5462_v46  ;;  %5327 = vmatprep.mubr.msk.bf16.mxu1 %vm929_vm2, %v5463_v47  ;;  %v5475_v45 = vld [vmem:[%s7601_s0 + $0x3d0] sm:$0xff]  }
  0xda   :  { %5200 = vmatmul.mubr.msk.bf16.gmra.mrb[104].mxu0 %vm929_vm2, %v5464_v48  ;;  %5328 = vmatmul.mubr.msk.bf16.gmra.mrb[104].mxu1 %vm929_vm2, %v5465_v49 }
  0xdb   :  { %5203 = vmatprep.mubr.msk.bf16.mxu0 %vm929_vm2, %v5466_v50  ;;  %5331 = vmatprep.mubr.msk.bf16.mxu1 %vm929_vm2, %v5467_v51 }
  0xdd   :  { %v5097_v53 = vpop.f32.mrb[0].mxu0  ;;  %v5225_v55 = vpop.f32.mrb[0].mxu1 }
  0xde   :  { %v2387_v56 = vmul.f32 %v5097_v53, %v5963_v52  ;;  %v2515_v57 = vmul.f32 %v5225_v55, %v5963_v52  ;;  %v1355_v58 = vpop.f32.mrb[1].mxu0  ;;  %v1867_v59 = vpop.f32.mrb[1].mxu1 }
  0xdf   :  { %v2385_v61 = vmul.f32 %v5963_v52, %v1355_v58  ;;  %v2513_v62 = vmul.f32 %v5963_v52, %v1867_v59  ;;  %v5098_v63 = vpop.f32.mrb[2].mxu0  ;;  %v5226_v0 = vpop.f32.mrb[2].mxu1 }
  0xe0   :  { %v2650_v2 = vadd.f32 %v5970_v54, %v2387_v56  ;;  %v2778_v3 = vadd.f32 %v5970_v54, %v2515_v57  ;;  %v2388_v4 = vmul.f32 %v5098_v63, %v5963_v52  ;;  %v2516_v5 = vmul.f32 %v5226_v0, %v5963_v52  ;;  %v1358_v6 = vpop.f32.mrb[3].mxu0  ;;  %v1870_v7 = vpop.f32.mrb[3].mxu1 }
  0xe1   :  { %v2648_v10 = vadd.f32 %v5970_v54, %v2385_v61  ;;  %v2776_v11 = vadd.f32 %v5970_v54, %v2513_v62  ;;  %v2386_v12 = vmul.f32 %v5963_v52, %v1358_v6  ;;  %v2514_v13 = vmul.f32 %v5963_v52, %v1870_v7  ;;  %v5476_v6 = vld [vmem:[%s7601_s0 + $0x1d8] sm:$0xff]  }
  0xe2   :  { %v4707_v14 = vpack.c.bf16 %v2650_v2, %v2650_v2  ;;  %v4835_v15 = vpack.c.bf16 %v2778_v3, %v2778_v3  ;;  %v2651_v16 = vadd.f32 %v5970_v54, %v2388_v4  ;;  %v2779_v17 = vadd.f32 %v5970_v54, %v2516_v5  ;;  %5204 = vmatmul.mubr.msk.bf16.gmra.mrb[108].mxu0 %vm929_vm2, %v5468_v60 }
  0xe3   :  { %v4705_v18 = vpack.c.bf16 %v2648_v10, %v2648_v10  ;;  %v4833_v19 = vpack.c.bf16 %v2776_v11, %v2776_v11  ;;  %v2649_v20 = vadd.f32 %v5970_v54, %v2386_v12  ;;  %v2777_v21 = vadd.f32 %v5970_v54, %v2514_v13  ;;  %5332 = vmatmul.mubr.msk.bf16.gmra.mrb[108].mxu1 %vm929_vm2, %v5469_v1  ;;  %v5477_v11 = vld [vmem:[%s7601_s0 + $0x3d8] sm:$0xff]  }
  0xe4   :  { %3931 = vst.msk [vmem:[%s7604_s4 + $0x8] sm:$0xf] %vm3928_vm3, %v4707_v14  ;;  %4059 = vst.msk [vmem:[%s7604_s4 + $0x208] sm:$0xf] %vm3928_vm3, %v4835_v15  ;;  %v4708_v22 = vpack.c.bf16 %v2651_v16, %v2651_v16  ;;  %v4836_v23 = vpack.c.bf16 %v2779_v17, %v2779_v17  ;;  %5207 = vmatprep.mubr.msk.bf16.mxu0 %vm929_vm2, %v5470_v8  ;;  %5335 = vmatprep.mubr.msk.bf16.mxu1 %vm929_vm2, %v5471_v9 }
  0xe5   :  { %3929 = vst.msk [vmem:[%s7604_s4] sm:$0xf] %vm3928_vm3, %v4705_v18  ;;  %4057 = vst.msk [vmem:[%s7604_s4 + $0x200] sm:$0xf] %vm3928_vm3, %v4833_v19  ;;  %v4706_v24 = vpack.c.bf16 %v2649_v20, %v2649_v20  ;;  %v4834_v25 = vpack.c.bf16 %v2777_v21, %v2777_v21  ;;  %v5101_v26 = vpop.f32.mrb[4].mxu0  ;;  %v5229_v27 = vpop.f32.mrb[4].mxu1 }
  0xe6   :  { %3932 = vst.msk [vmem:[%s7604_s4 + $0xc] sm:$0xf] %vm3928_vm3, %v4708_v22  ;;  %4060 = vst.msk [vmem:[%s7604_s4 + $0x20c] sm:$0xf] %vm3928_vm3, %v4836_v23  ;;  %v2391_v28 = vmul.f32 %v5101_v26, %v5963_v52  ;;  %v2519_v29 = vmul.f32 %v5229_v27, %v5963_v52  ;;  %v1371_v30 = vpop.f32.mrb[5].mxu0  ;;  %v1883_v31 = vpop.f32.mrb[5].mxu1 }
  0xe7   :  { %3930 = vst.msk [vmem:[%s7604_s4 + $0x4] sm:$0xf] %vm3928_vm3, %v4706_v24  ;;  %4058 = vst.msk [vmem:[%s7604_s4 + $0x204] sm:$0xf] %vm3928_vm3, %v4834_v25  ;;  %v2389_v33 = vmul.f32 %v5963_v52, %v1371_v30  ;;  %v2517_v34 = vmul.f32 %v5963_v52, %v1883_v31  ;;  %v5102_v35 = vpop.f32.mrb[6].mxu0  ;;  %v5230_v36 = vpop.f32.mrb[6].mxu1 }
  0xe8   :  { %v2654_v38 = vadd.f32 %v5970_v54, %v2391_v28  ;;  %v2782_v39 = vadd.f32 %v5970_v54, %v2519_v29  ;;  %v2392_v40 = vmul.f32 %v5102_v35, %v5963_v52  ;;  %v2520_v41 = vmul.f32 %v5230_v36, %v5963_v52  ;;  %v1374_v42 = vpop.f32.mrb[7].mxu0  ;;  %v1886_v43 = vpop.f32.mrb[7].mxu1  ;;  %v5478_v18 = vld [vmem:[%s7601_s0 + $0x1e0] sm:$0xff]  }
  0xe9   :  { %v2652_v46 = vadd.f32 %v5970_v54, %v2389_v33  ;;  %v2780_v47 = vadd.f32 %v5970_v54, %v2517_v34  ;;  %v2390_v48 = vmul.f32 %v5963_v52, %v1374_v42  ;;  %v2518_v49 = vmul.f32 %v5963_v52, %v1886_v43  ;;  %v5479_v19 = vld [vmem:[%s7601_s0 + $0x3e0] sm:$0xff]   ;;  %v5480_v42 = vld [vmem:[%s7601_s0 + $0x1e8] sm:$0xff]  }
  0xea   :  { %v4711_v50 = vpack.c.bf16 %v2654_v38, %v2654_v38  ;;  %v4839_v51 = vpack.c.bf16 %v2782_v39, %v2782_v39  ;;  %v2655_v53 = vadd.f32 %v5970_v54, %v2392_v40  ;;  %v2783_v55 = vadd.f32 %v5970_v54, %v2520_v41  ;;  %5208 = vmatmul.mubr.msk.bf16.gmra.mrb[112].mxu0 %vm929_vm2, %v5472_v32 }
  0xeb   :  { %v4709_v56 = vpack.c.bf16 %v2652_v46, %v2652_v46  ;;  %v4837_v57 = vpack.c.bf16 %v2780_v47, %v2780_v47  ;;  %v2653_v58 = vadd.f32 %v5970_v54, %v2390_v48  ;;  %v2781_v59 = vadd.f32 %v5970_v54, %v2518_v49  ;;  %5336 = vmatmul.mubr.msk.bf16.gmra.mrb[112].mxu1 %vm929_vm2, %v5473_v37  ;;  %v5481_v47 = vld [vmem:[%s7601_s0 + $0x3e8] sm:$0xff]  }
  0xec   :  { %3935 = vst.msk [vmem:[%s7604_s4 + $0x18] sm:$0xf] %vm3928_vm3, %v4711_v50  ;;  %4063 = vst.msk [vmem:[%s7604_s4 + $0x218] sm:$0xf] %vm3928_vm3, %v4839_v51  ;;  %v4712_v60 = vpack.c.bf16 %v2655_v53, %v2655_v53  ;;  %v4840_v61 = vpack.c.bf16 %v2783_v55, %v2783_v55  ;;  %5211 = vmatprep.mubr.msk.bf16.mxu0 %vm929_vm2, %v5474_v44  ;;  %5339 = vmatprep.mubr.msk.bf16.mxu1 %vm929_vm2, %v5475_v45 }
  0xed   :  { %3933 = vst.msk [vmem:[%s7604_s4 + $0x10] sm:$0xf] %vm3928_vm3, %v4709_v56  ;;  %4061 = vst.msk [vmem:[%s7604_s4 + $0x210] sm:$0xf] %vm3928_vm3, %v4837_v57  ;;  %v4710_v62 = vpack.c.bf16 %v2653_v58, %v2653_v58  ;;  %v4838_v63 = vpack.c.bf16 %v2781_v59, %v2781_v59  ;;  %v5105_v0 = vpop.f32.mrb[8].mxu0  ;;  %v5233_v1 = vpop.f32.mrb[8].mxu1 }
  0xee   :  { %3936 = vst.msk [vmem:[%s7604_s4 + $0x1c] sm:$0xf] %vm3928_vm3, %v4712_v60  ;;  %4064 = vst.msk [vmem:[%s7604_s4 + $0x21c] sm:$0xf] %vm3928_vm3, %v4840_v61  ;;  %v2395_v2 = vmul.f32 %v5105_v0, %v5963_v52  ;;  %v2523_v3 = vmul.f32 %v5233_v1, %v5963_v52  ;;  %v1387_v4 = vpop.f32.mrb[9].mxu0  ;;  %v1899_v5 = vpop.f32.mrb[9].mxu1 }
  0xef   :  { %3934 = vst.msk [vmem:[%s7604_s4 + $0x14] sm:$0xf] %vm3928_vm3, %v4710_v62  ;;  %4062 = vst.msk [vmem:[%s7604_s4 + $0x214] sm:$0xf] %vm3928_vm3, %v4838_v63  ;;  %v2393_v7 = vmul.f32 %v5963_v52, %v1387_v4  ;;  %v2521_v8 = vmul.f32 %v5963_v52, %v1899_v5  ;;  %v5106_v9 = vpop.f32.mrb[10].mxu0  ;;  %v5234_v10 = vpop.f32.mrb[10].mxu1 }
  0xf0   :  { %v2658_v12 = vadd.f32 %v5970_v54, %v2395_v2  ;;  %v2786_v13 = vadd.f32 %v5970_v54, %v2523_v3  ;;  %v2396_v14 = vmul.f32 %v5106_v9, %v5963_v52  ;;  %v2524_v15 = vmul.f32 %v5234_v10, %v5963_v52  ;;  %v1390_v16 = vpop.f32.mrb[11].mxu0  ;;  %v1902_v17 = vpop.f32.mrb[11].mxu1  ;;  %v5482_v56 = vld [vmem:[%s7601_s0 + $0x1f0] sm:$0xff]  }
  0xf1   :  { %v2656_v20 = vadd.f32 %v5970_v54, %v2393_v7  ;;  %v2784_v21 = vadd.f32 %v5970_v54, %v2521_v8  ;;  %v2394_v22 = vmul.f32 %v5963_v52, %v1390_v16  ;;  %v2522_v23 = vmul.f32 %v5963_v52, %v1902_v17  ;;  %v5483_v57 = vld [vmem:[%s7601_s0 + $0x3f0] sm:$0xff]   ;;  %v5484_v16 = vld [vmem:[%s7601_s0 + $0x1f8] sm:$0xff]  }
  0xf2   :  { %v4715_v24 = vpack.c.bf16 %v2658_v12, %v2658_v12  ;;  %v4843_v25 = vpack.c.bf16 %v2786_v13, %v2786_v13  ;;  %v2659_v26 = vadd.f32 %v5970_v54, %v2396_v14  ;;  %v2787_v27 = vadd.f32 %v5970_v54, %v2524_v15  ;;  %5212 = vmatmul.mubr.msk.bf16.gmra.mrb[116].mxu0 %vm929_vm2, %v5476_v6 }
  0xf3   :  { %v4713_v28 = vpack.c.bf16 %v2656_v20, %v2656_v20  ;;  %v4841_v29 = vpack.c.bf16 %v2784_v21, %v2784_v21  ;;  %v2657_v30 = vadd.f32 %v5970_v54, %v2394_v22  ;;  %v2785_v31 = vadd.f32 %v5970_v54, %v2522_v23  ;;  %5340 = vmatmul.mubr.msk.bf16.gmra.mrb[116].mxu1 %vm929_vm2, %v5477_v11  ;;  %v5485_v21 = vld [vmem:[%s7601_s0 + $0x3f8] sm:$0xff]  }
  0xf4   :  { %3939 = vst.msk [vmem:[%s7604_s4 + $0x28] sm:$0xf] %vm3928_vm3, %v4715_v24  ;;  %4067 = vst.msk [vmem:[%s7604_s4 + $0x228] sm:$0xf] %vm3928_vm3, %v4843_v25  ;;  %v4716_v32 = vpack.c.bf16 %v2659_v26, %v2659_v26  ;;  %v4844_v33 = vpack.c.bf16 %v2787_v27, %v2787_v27  ;;  %5215 = vmatprep.mubr.msk.bf16.mxu0 %vm929_vm2, %v5478_v18  ;;  %5343 = vmatprep.mubr.msk.bf16.mxu1 %vm929_vm2, %v5479_v19 }
  0xf5   :  { %3937 = vst.msk [vmem:[%s7604_s4 + $0x20] sm:$0xf] %vm3928_vm3, %v4713_v28  ;;  %4065 = vst.msk [vmem:[%s7604_s4 + $0x220] sm:$0xf] %vm3928_vm3, %v4841_v29  ;;  %v4714_v34 = vpack.c.bf16 %v2657_v30, %v2657_v30  ;;  %v4842_v35 = vpack.c.bf16 %v2785_v31, %v2785_v31  ;;  %v5109_v36 = vpop.f32.mrb[12].mxu0  ;;  %v5237_v37 = vpop.f32.mrb[12].mxu1 }
  0xf6   :  { %3940 = vst.msk [vmem:[%s7604_s4 + $0x2c] sm:$0xf] %vm3928_vm3, %v4716_v32  ;;  %4068 = vst.msk [vmem:[%s7604_s4 + $0x22c] sm:$0xf] %vm3928_vm3, %v4844_v33  ;;  %v2399_v38 = vmul.f32 %v5109_v36, %v5963_v52  ;;  %v2527_v39 = vmul.f32 %v5237_v37, %v5963_v52  ;;  %v1403_v40 = vpop.f32.mrb[13].mxu0  ;;  %v1915_v41 = vpop.f32.mrb[13].mxu1 }
  0xf7   :  { %3938 = vst.msk [vmem:[%s7604_s4 + $0x24] sm:$0xf] %vm3928_vm3, %v4714_v34  ;;  %4066 = vst.msk [vmem:[%s7604_s4 + $0x224] sm:$0xf] %vm3928_vm3, %v4842_v35  ;;  %v2397_v43 = vmul.f32 %v5963_v52, %v1403_v40  ;;  %v2525_v44 = vmul.f32 %v5963_v52, %v1915_v41  ;;  %v5110_v45 = vpop.f32.mrb[14].mxu0  ;;  %v5238_v46 = vpop.f32.mrb[14].mxu1 }
  0xf8   :  { %v2662_v48 = vadd.f32 %v5970_v54, %v2399_v38  ;;  %v2790_v49 = vadd.f32 %v5970_v54, %v2527_v39  ;;  %v2400_v50 = vmul.f32 %v5110_v45, %v5963_v52  ;;  %v2528_v51 = vmul.f32 %v5238_v46, %v5963_v52  ;;  %v1406_v53 = vpop.f32.mrb[15].mxu0  ;;  %v1918_v55 = vpop.f32.mrb[15].mxu1 }
  0xf9   :  { %v2660_v58 = vadd.f32 %v5970_v54, %v2397_v43  ;;  %v2788_v59 = vadd.f32 %v5970_v54, %v2525_v44  ;;  %v2398_v60 = vmul.f32 %v5963_v52, %v1406_v53  ;;  %v2526_v61 = vmul.f32 %v5963_v52, %v1918_v55 }
  0xfa   :  { %v4719_v62 = vpack.c.bf16 %v2662_v48, %v2662_v48  ;;  %v4847_v63 = vpack.c.bf16 %v2790_v49, %v2790_v49  ;;  %v2663_v0 = vadd.f32 %v5970_v54, %v2400_v50  ;;  %v2791_v1 = vadd.f32 %v5970_v54, %v2528_v51  ;;  %5216 = vmatmul.mubr.msk.bf16.gmra.mrb[120].mxu0 %vm929_vm2, %v5480_v42 }
  0xfb   :  { %v4717_v2 = vpack.c.bf16 %v2660_v58, %v2660_v58  ;;  %v4845_v3 = vpack.c.bf16 %v2788_v59, %v2788_v59  ;;  %v2661_v4 = vadd.f32 %v5970_v54, %v2398_v60  ;;  %v2789_v5 = vadd.f32 %v5970_v54, %v2526_v61  ;;  %5344 = vmatmul.mubr.msk.bf16.gmra.mrb[120].mxu1 %vm929_vm2, %v5481_v47 }
  0xfc   :  { %3943 = vst.msk [vmem:[%s7604_s4 + $0x38] sm:$0xf] %vm3928_vm3, %v4719_v62  ;;  %4071 = vst.msk [vmem:[%s7604_s4 + $0x238] sm:$0xf] %vm3928_vm3, %v4847_v63  ;;  %v4720_v6 = vpack.c.bf16 %v2663_v0, %v2663_v0  ;;  %v4848_v7 = vpack.c.bf16 %v2791_v1, %v2791_v1  ;;  %5219 = vmatprep.mubr.msk.bf16.mxu0 %vm929_vm2, %v5482_v56  ;;  %5347 = vmatprep.mubr.msk.bf16.mxu1 %vm929_vm2, %v5483_v57 }
  0xfd   :  { %3941 = vst.msk [vmem:[%s7604_s4 + $0x30] sm:$0xf] %vm3928_vm3, %v4717_v2  ;;  %4069 = vst.msk [vmem:[%s7604_s4 + $0x230] sm:$0xf] %vm3928_vm3, %v4845_v3  ;;  %v4718_v8 = vpack.c.bf16 %v2661_v4, %v2661_v4  ;;  %v4846_v9 = vpack.c.bf16 %v2789_v5, %v2789_v5  ;;  %v5113_v10 = vpop.f32.mrb[16].mxu0  ;;  %v5241_v11 = vpop.f32.mrb[16].mxu1 }
  0xfe   :  { %3944 = vst.msk [vmem:[%s7604_s4 + $0x3c] sm:$0xf] %vm3928_vm3, %v4720_v6  ;;  %4072 = vst.msk [vmem:[%s7604_s4 + $0x23c] sm:$0xf] %vm3928_vm3, %v4848_v7  ;;  %v2403_v12 = vmul.f32 %v5113_v10, %v5963_v52  ;;  %v2531_v13 = vmul.f32 %v5241_v11, %v5963_v52  ;;  %v1419_v14 = vpop.f32.mrb[17].mxu0  ;;  %v1931_v15 = vpop.f32.mrb[17].mxu1 }
  0xff   :  { %3942 = vst.msk [vmem:[%s7604_s4 + $0x34] sm:$0xf] %vm3928_vm3, %v4718_v8  ;;  %4070 = vst.msk [vmem:[%s7604_s4 + $0x234] sm:$0xf] %vm3928_vm3, %v4846_v9  ;;  %v2401_v17 = vmul.f32 %v5963_v52, %v1419_v14  ;;  %v2529_v18 = vmul.f32 %v5963_v52, %v1931_v15  ;;  %v5114_v19 = vpop.f32.mrb[18].mxu0  ;;  %v5242_v20 = vpop.f32.mrb[18].mxu1 }
 0x100   :  { %v2666_v22 = vadd.f32 %v5970_v54, %v2403_v12  ;;  %v2794_v23 = vadd.f32 %v5970_v54, %v2531_v13  ;;  %v2404_v24 = vmul.f32 %v5114_v19, %v5963_v52  ;;  %v2532_v25 = vmul.f32 %v5242_v20, %v5963_v52  ;;  %v1422_v26 = vpop.f32.mrb[19].mxu0  ;;  %v1934_v27 = vpop.f32.mrb[19].mxu1 }
 0x101   :  { %v2664_v28 = vadd.f32 %v5970_v54, %v2401_v17  ;;  %v2792_v29 = vadd.f32 %v5970_v54, %v2529_v18  ;;  %v2402_v30 = vmul.f32 %v5963_v52, %v1422_v26  ;;  %v2530_v31 = vmul.f32 %v5963_v52, %v1934_v27 }
 0x102   :  { %v4723_v32 = vpack.c.bf16 %v2666_v22, %v2666_v22  ;;  %v4851_v33 = vpack.c.bf16 %v2794_v23, %v2794_v23  ;;  %v2667_v34 = vadd.f32 %v5970_v54, %v2404_v24  ;;  %v2795_v35 = vadd.f32 %v5970_v54, %v2532_v25  ;;  %5220 = vmatmul.mubr.msk.bf16.gmra.mrb[124].mxu0 %vm929_vm2, %v5484_v16 }
 0x103   :  { %v4721_v36 = vpack.c.bf16 %v2664_v28, %v2664_v28  ;;  %v4849_v37 = vpack.c.bf16 %v2792_v29, %v2792_v29  ;;  %v2665_v38 = vadd.f32 %v5970_v54, %v2402_v30  ;;  %v2793_v39 = vadd.f32 %v5970_v54, %v2530_v31  ;;  %5348 = vmatmul.mubr.msk.bf16.gmra.mrb[124].mxu1 %vm929_vm2, %v5485_v21 }
 0x104   :  { %3947 = vst.msk [vmem:[%s7604_s4 + $0x48] sm:$0xf] %vm3928_vm3, %v4723_v32  ;;  %4075 = vst.msk [vmem:[%s7604_s4 + $0x248] sm:$0xf] %vm3928_vm3, %v4851_v33  ;;  %v4724_v40 = vpack.c.bf16 %v2667_v34, %v2667_v34  ;;  %v4852_v41 = vpack.c.bf16 %v2795_v35, %v2795_v35 }
 0x105   :  { %3945 = vst.msk [vmem:[%s7604_s4 + $0x40] sm:$0xf] %vm3928_vm3, %v4721_v36  ;;  %4073 = vst.msk [vmem:[%s7604_s4 + $0x240] sm:$0xf] %vm3928_vm3, %v4849_v37  ;;  %v4722_v42 = vpack.c.bf16 %v2665_v38, %v2665_v38  ;;  %v4850_v43 = vpack.c.bf16 %v2793_v39, %v2793_v39  ;;  %v5117_v44 = vpop.f32.mrb[20].mxu0  ;;  %v5245_v45 = vpop.f32.mrb[20].mxu1 }
 0x106   :  { %3948 = vst.msk [vmem:[%s7604_s4 + $0x4c] sm:$0xf] %vm3928_vm3, %v4724_v40  ;;  %4076 = vst.msk [vmem:[%s7604_s4 + $0x24c] sm:$0xf] %vm3928_vm3, %v4852_v41  ;;  %v2407_v46 = vmul.f32 %v5117_v44, %v5963_v52  ;;  %v2535_v47 = vmul.f32 %v5245_v45, %v5963_v52  ;;  %v1435_v48 = vpop.f32.mrb[21].mxu0  ;;  %v1947_v49 = vpop.f32.mrb[21].mxu1 }
 0x107   :  { %3946 = vst.msk [vmem:[%s7604_s4 + $0x44] sm:$0xf] %vm3928_vm3, %v4722_v42  ;;  %4074 = vst.msk [vmem:[%s7604_s4 + $0x244] sm:$0xf] %vm3928_vm3, %v4850_v43  ;;  %v2405_v50 = vmul.f32 %v5963_v52, %v1435_v48  ;;  %v2533_v51 = vmul.f32 %v5963_v52, %v1947_v49  ;;  %v5118_v53 = vpop.f32.mrb[22].mxu0  ;;  %v5246_v55 = vpop.f32.mrb[22].mxu1 }
 0x108   :  { %v2670_v56 = vadd.f32 %v5970_v54, %v2407_v46  ;;  %v2798_v57 = vadd.f32 %v5970_v54, %v2535_v47  ;;  %v2408_v58 = vmul.f32 %v5118_v53, %v5963_v52  ;;  %v2536_v59 = vmul.f32 %v5246_v55, %v5963_v52  ;;  %v1438_v60 = vpop.f32.mrb[23].mxu0  ;;  %v1950_v61 = vpop.f32.mrb[23].mxu1 }
 0x109   :  { %v2668_v62 = vadd.f32 %v5970_v54, %v2405_v50  ;;  %v2796_v63 = vadd.f32 %v5970_v54, %v2533_v51  ;;  %v2406_v0 = vmul.f32 %v5963_v52, %v1438_v60  ;;  %v2534_v1 = vmul.f32 %v5963_v52, %v1950_v61 }
 0x10a   :  { %v4727_v2 = vpack.c.bf16 %v2670_v56, %v2670_v56  ;;  %v4855_v3 = vpack.c.bf16 %v2798_v57, %v2798_v57  ;;  %v2671_v4 = vadd.f32 %v5970_v54, %v2408_v58  ;;  %v2799_v5 = vadd.f32 %v5970_v54, %v2536_v59 }
 0x10b   :  { %v4725_v6 = vpack.c.bf16 %v2668_v62, %v2668_v62  ;;  %v4853_v7 = vpack.c.bf16 %v2796_v63, %v2796_v63  ;;  %v2669_v8 = vadd.f32 %v5970_v54, %v2406_v0  ;;  %v2797_v9 = vadd.f32 %v5970_v54, %v2534_v1 }
 0x10c   :  { %3951 = vst.msk [vmem:[%s7604_s4 + $0x58] sm:$0xf] %vm3928_vm3, %v4727_v2  ;;  %4079 = vst.msk [vmem:[%s7604_s4 + $0x258] sm:$0xf] %vm3928_vm3, %v4855_v3  ;;  %v4728_v10 = vpack.c.bf16 %v2671_v4, %v2671_v4  ;;  %v4856_v11 = vpack.c.bf16 %v2799_v5, %v2799_v5 }
 0x10d   :  { %3949 = vst.msk [vmem:[%s7604_s4 + $0x50] sm:$0xf] %vm3928_vm3, %v4725_v6  ;;  %4077 = vst.msk [vmem:[%s7604_s4 + $0x250] sm:$0xf] %vm3928_vm3, %v4853_v7  ;;  %v4726_v12 = vpack.c.bf16 %v2669_v8, %v2669_v8  ;;  %v4854_v13 = vpack.c.bf16 %v2797_v9, %v2797_v9  ;;  %v5121_v14 = vpop.f32.mrb[24].mxu0  ;;  %v5249_v15 = vpop.f32.mrb[24].mxu1 }
 0x10e   :  { %3952 = vst.msk [vmem:[%s7604_s4 + $0x5c] sm:$0xf] %vm3928_vm3, %v4728_v10  ;;  %4080 = vst.msk [vmem:[%s7604_s4 + $0x25c] sm:$0xf] %vm3928_vm3, %v4856_v11  ;;  %v2411_v16 = vmul.f32 %v5121_v14, %v5963_v52  ;;  %v2539_v17 = vmul.f32 %v5249_v15, %v5963_v52  ;;  %v1451_v18 = vpop.f32.mrb[25].mxu0  ;;  %v1963_v19 = vpop.f32.mrb[25].mxu1 }
 0x10f   :  { %3950 = vst.msk [vmem:[%s7604_s4 + $0x54] sm:$0xf] %vm3928_vm3, %v4726_v12  ;;  %4078 = vst.msk [vmem:[%s7604_s4 + $0x254] sm:$0xf] %vm3928_vm3, %v4854_v13  ;;  %v2409_v20 = vmul.f32 %v5963_v52, %v1451_v18  ;;  %v2537_v21 = vmul.f32 %v5963_v52, %v1963_v19  ;;  %v5122_v22 = vpop.f32.mrb[26].mxu0  ;;  %v5250_v23 = vpop.f32.mrb[26].mxu1 }
 0x110   :  { %v2674_v24 = vadd.f32 %v5970_v54, %v2411_v16  ;;  %v2802_v25 = vadd.f32 %v5970_v54, %v2539_v17  ;;  %v2412_v26 = vmul.f32 %v5122_v22, %v5963_v52  ;;  %v2540_v27 = vmul.f32 %v5250_v23, %v5963_v52  ;;  %v1454_v28 = vpop.f32.mrb[27].mxu0  ;;  %v1966_v29 = vpop.f32.mrb[27].mxu1 }
 0x111   :  { %v2672_v30 = vadd.f32 %v5970_v54, %v2409_v20  ;;  %v2800_v31 = vadd.f32 %v5970_v54, %v2537_v21  ;;  %v2410_v32 = vmul.f32 %v5963_v52, %v1454_v28  ;;  %v2538_v33 = vmul.f32 %v5963_v52, %v1966_v29 }
 0x112   :  { %v4731_v34 = vpack.c.bf16 %v2674_v24, %v2674_v24  ;;  %v4859_v35 = vpack.c.bf16 %v2802_v25, %v2802_v25  ;;  %v2675_v36 = vadd.f32 %v5970_v54, %v2412_v26  ;;  %v2803_v37 = vadd.f32 %v5970_v54, %v2540_v27 }
 0x113   :  { %v4729_v38 = vpack.c.bf16 %v2672_v30, %v2672_v30  ;;  %v4857_v39 = vpack.c.bf16 %v2800_v31, %v2800_v31  ;;  %v2673_v40 = vadd.f32 %v5970_v54, %v2410_v32  ;;  %v2801_v41 = vadd.f32 %v5970_v54, %v2538_v33 }
 0x114   :  { %3955 = vst.msk [vmem:[%s7604_s4 + $0x68] sm:$0xf] %vm3928_vm3, %v4731_v34  ;;  %4083 = vst.msk [vmem:[%s7604_s4 + $0x268] sm:$0xf] %vm3928_vm3, %v4859_v35  ;;  %v4732_v42 = vpack.c.bf16 %v2675_v36, %v2675_v36  ;;  %v4860_v43 = vpack.c.bf16 %v2803_v37, %v2803_v37 }
 0x115   :  { %3953 = vst.msk [vmem:[%s7604_s4 + $0x60] sm:$0xf] %vm3928_vm3, %v4729_v38  ;;  %4081 = vst.msk [vmem:[%s7604_s4 + $0x260] sm:$0xf] %vm3928_vm3, %v4857_v39  ;;  %v4730_v44 = vpack.c.bf16 %v2673_v40, %v2673_v40  ;;  %v4858_v45 = vpack.c.bf16 %v2801_v41, %v2801_v41  ;;  %v5125_v46 = vpop.f32.mrb[28].mxu0  ;;  %v5253_v47 = vpop.f32.mrb[28].mxu1 }
 0x116   :  { %3956 = vst.msk [vmem:[%s7604_s4 + $0x6c] sm:$0xf] %vm3928_vm3, %v4732_v42  ;;  %4084 = vst.msk [vmem:[%s7604_s4 + $0x26c] sm:$0xf] %vm3928_vm3, %v4860_v43  ;;  %v2415_v48 = vmul.f32 %v5125_v46, %v5963_v52  ;;  %v2543_v49 = vmul.f32 %v5253_v47, %v5963_v52  ;;  %v1467_v50 = vpop.f32.mrb[29].mxu0  ;;  %v1979_v51 = vpop.f32.mrb[29].mxu1 }
 0x117   :  { %3954 = vst.msk [vmem:[%s7604_s4 + $0x64] sm:$0xf] %vm3928_vm3, %v4730_v44  ;;  %4082 = vst.msk [vmem:[%s7604_s4 + $0x264] sm:$0xf] %vm3928_vm3, %v4858_v45  ;;  %v2413_v53 = vmul.f32 %v5963_v52, %v1467_v50  ;;  %v2541_v55 = vmul.f32 %v5963_v52, %v1979_v51  ;;  %v5126_v56 = vpop.f32.mrb[30].mxu0  ;;  %v5254_v57 = vpop.f32.mrb[30].mxu1 }
 0x118   :  { %v2678_v58 = vadd.f32 %v5970_v54, %v2415_v48  ;;  %v2806_v59 = vadd.f32 %v5970_v54, %v2543_v49  ;;  %v2416_v60 = vmul.f32 %v5126_v56, %v5963_v52  ;;  %v2544_v61 = vmul.f32 %v5254_v57, %v5963_v52  ;;  %v1470_v62 = vpop.f32.mrb[31].mxu0  ;;  %v1982_v63 = vpop.f32.mrb[31].mxu1 }
 0x119   :  { %v2676_v0 = vadd.f32 %v5970_v54, %v2413_v53  ;;  %v2804_v1 = vadd.f32 %v5970_v54, %v2541_v55  ;;  %v2414_v2 = vmul.f32 %v5963_v52, %v1470_v62  ;;  %v2542_v3 = vmul.f32 %v5963_v52, %v1982_v63 }
 0x11a   :  { %v4735_v4 = vpack.c.bf16 %v2678_v58, %v2678_v58  ;;  %v4863_v5 = vpack.c.bf16 %v2806_v59, %v2806_v59  ;;  %v2679_v6 = vadd.f32 %v5970_v54, %v2416_v60  ;;  %v2807_v7 = vadd.f32 %v5970_v54, %v2544_v61 }
 0x11b   :  { %v4733_v8 = vpack.c.bf16 %v2676_v0, %v2676_v0  ;;  %v4861_v9 = vpack.c.bf16 %v2804_v1, %v2804_v1  ;;  %v2677_v10 = vadd.f32 %v5970_v54, %v2414_v2  ;;  %v2805_v11 = vadd.f32 %v5970_v54, %v2542_v3 }
 0x11c   :  { %3959 = vst.msk [vmem:[%s7604_s4 + $0x78] sm:$0xf] %vm3928_vm3, %v4735_v4  ;;  %4087 = vst.msk [vmem:[%s7604_s4 + $0x278] sm:$0xf] %vm3928_vm3, %v4863_v5  ;;  %v4736_v12 = vpack.c.bf16 %v2679_v6, %v2679_v6  ;;  %v4864_v13 = vpack.c.bf16 %v2807_v7, %v2807_v7 }
 0x11d   :  { %3957 = vst.msk [vmem:[%s7604_s4 + $0x70] sm:$0xf] %vm3928_vm3, %v4733_v8  ;;  %4085 = vst.msk [vmem:[%s7604_s4 + $0x270] sm:$0xf] %vm3928_vm3, %v4861_v9  ;;  %v4734_v14 = vpack.c.bf16 %v2677_v10, %v2677_v10  ;;  %v4862_v15 = vpack.c.bf16 %v2805_v11, %v2805_v11  ;;  %v5129_v16 = vpop.f32.mrb[32].mxu0  ;;  %v5257_v17 = vpop.f32.mrb[32].mxu1 }
 0x11e   :  { %3960 = vst.msk [vmem:[%s7604_s4 + $0x7c] sm:$0xf] %vm3928_vm3, %v4736_v12  ;;  %4088 = vst.msk [vmem:[%s7604_s4 + $0x27c] sm:$0xf] %vm3928_vm3, %v4864_v13  ;;  %v2419_v18 = vmul.f32 %v5129_v16, %v5963_v52  ;;  %v2547_v19 = vmul.f32 %v5257_v17, %v5963_v52  ;;  %v1483_v20 = vpop.f32.mrb[33].mxu0  ;;  %v1995_v21 = vpop.f32.mrb[33].mxu1 }
 0x11f   :  { %3958 = vst.msk [vmem:[%s7604_s4 + $0x74] sm:$0xf] %vm3928_vm3, %v4734_v14  ;;  %4086 = vst.msk [vmem:[%s7604_s4 + $0x274] sm:$0xf] %vm3928_vm3, %v4862_v15  ;;  %v2417_v22 = vmul.f32 %v5963_v52, %v1483_v20  ;;  %v2545_v23 = vmul.f32 %v5963_v52, %v1995_v21  ;;  %v5130_v24 = vpop.f32.mrb[34].mxu0  ;;  %v5258_v25 = vpop.f32.mrb[34].mxu1 }
 0x120   :  { %v2682_v26 = vadd.f32 %v5970_v54, %v2419_v18  ;;  %v2810_v27 = vadd.f32 %v5970_v54, %v2547_v19  ;;  %v2420_v28 = vmul.f32 %v5130_v24, %v5963_v52  ;;  %v2548_v29 = vmul.f32 %v5258_v25, %v5963_v52  ;;  %v1486_v30 = vpop.f32.mrb[35].mxu0  ;;  %v1998_v31 = vpop.f32.mrb[35].mxu1 }
 0x121   :  { %v2680_v32 = vadd.f32 %v5970_v54, %v2417_v22  ;;  %v2808_v33 = vadd.f32 %v5970_v54, %v2545_v23  ;;  %v2418_v34 = vmul.f32 %v5963_v52, %v1486_v30  ;;  %v2546_v35 = vmul.f32 %v5963_v52, %v1998_v31 }
 0x122   :  { %v4739_v36 = vpack.c.bf16 %v2682_v26, %v2682_v26  ;;  %v4867_v37 = vpack.c.bf16 %v2810_v27, %v2810_v27  ;;  %v2683_v38 = vadd.f32 %v5970_v54, %v2420_v28  ;;  %v2811_v39 = vadd.f32 %v5970_v54, %v2548_v29 }
 0x123   :  { %v4737_v40 = vpack.c.bf16 %v2680_v32, %v2680_v32  ;;  %v4865_v41 = vpack.c.bf16 %v2808_v33, %v2808_v33  ;;  %v2681_v42 = vadd.f32 %v5970_v54, %v2418_v34  ;;  %v2809_v43 = vadd.f32 %v5970_v54, %v2546_v35 }
 0x124   :  { %3963 = vst.msk [vmem:[%s7604_s4 + $0x88] sm:$0xf] %vm3928_vm3, %v4739_v36  ;;  %4091 = vst.msk [vmem:[%s7604_s4 + $0x288] sm:$0xf] %vm3928_vm3, %v4867_v37  ;;  %v4740_v44 = vpack.c.bf16 %v2683_v38, %v2683_v38  ;;  %v4868_v45 = vpack.c.bf16 %v2811_v39, %v2811_v39 }
 0x125   :  { %3961 = vst.msk [vmem:[%s7604_s4 + $0x80] sm:$0xf] %vm3928_vm3, %v4737_v40  ;;  %4089 = vst.msk [vmem:[%s7604_s4 + $0x280] sm:$0xf] %vm3928_vm3, %v4865_v41  ;;  %v4738_v46 = vpack.c.bf16 %v2681_v42, %v2681_v42  ;;  %v4866_v47 = vpack.c.bf16 %v2809_v43, %v2809_v43  ;;  %v5133_v48 = vpop.f32.mrb[36].mxu0  ;;  %v5261_v49 = vpop.f32.mrb[36].mxu1 }
 0x126   :  { %3964 = vst.msk [vmem:[%s7604_s4 + $0x8c] sm:$0xf] %vm3928_vm3, %v4740_v44  ;;  %4092 = vst.msk [vmem:[%s7604_s4 + $0x28c] sm:$0xf] %vm3928_vm3, %v4868_v45  ;;  %v2423_v50 = vmul.f32 %v5133_v48, %v5963_v52  ;;  %v2551_v51 = vmul.f32 %v5261_v49, %v5963_v52  ;;  %v1499_v53 = vpop.f32.mrb[37].mxu0  ;;  %v2011_v55 = vpop.f32.mrb[37].mxu1 }
 0x127   :  { %3962 = vst.msk [vmem:[%s7604_s4 + $0x84] sm:$0xf] %vm3928_vm3, %v4738_v46  ;;  %4090 = vst.msk [vmem:[%s7604_s4 + $0x284] sm:$0xf] %vm3928_vm3, %v4866_v47  ;;  %v2421_v56 = vmul.f32 %v5963_v52, %v1499_v53  ;;  %v2549_v57 = vmul.f32 %v5963_v52, %v2011_v55  ;;  %v5134_v58 = vpop.f32.mrb[38].mxu0  ;;  %v5262_v59 = vpop.f32.mrb[38].mxu1 }
 0x128   :  { %v2686_v60 = vadd.f32 %v5970_v54, %v2423_v50  ;;  %v2814_v61 = vadd.f32 %v5970_v54, %v2551_v51  ;;  %v2424_v62 = vmul.f32 %v5134_v58, %v5963_v52  ;;  %v2552_v63 = vmul.f32 %v5262_v59, %v5963_v52  ;;  %v1502_v0 = vpop.f32.mrb[39].mxu0  ;;  %v2014_v1 = vpop.f32.mrb[39].mxu1 }
 0x129   :  { %v2684_v2 = vadd.f32 %v5970_v54, %v2421_v56  ;;  %v2812_v3 = vadd.f32 %v5970_v54, %v2549_v57  ;;  %v2422_v4 = vmul.f32 %v5963_v52, %v1502_v0  ;;  %v2550_v5 = vmul.f32 %v5963_v52, %v2014_v1 }
 0x12a   :  { %v4743_v6 = vpack.c.bf16 %v2686_v60, %v2686_v60  ;;  %v4871_v7 = vpack.c.bf16 %v2814_v61, %v2814_v61  ;;  %v2687_v8 = vadd.f32 %v5970_v54, %v2424_v62  ;;  %v2815_v9 = vadd.f32 %v5970_v54, %v2552_v63 }
 0x12b   :  { %v4741_v10 = vpack.c.bf16 %v2684_v2, %v2684_v2  ;;  %v4869_v11 = vpack.c.bf16 %v2812_v3, %v2812_v3  ;;  %v2685_v12 = vadd.f32 %v5970_v54, %v2422_v4  ;;  %v2813_v13 = vadd.f32 %v5970_v54, %v2550_v5 }
 0x12c   :  { %3967 = vst.msk [vmem:[%s7604_s4 + $0x98] sm:$0xf] %vm3928_vm3, %v4743_v6  ;;  %4095 = vst.msk [vmem:[%s7604_s4 + $0x298] sm:$0xf] %vm3928_vm3, %v4871_v7  ;;  %v4744_v14 = vpack.c.bf16 %v2687_v8, %v2687_v8  ;;  %v4872_v15 = vpack.c.bf16 %v2815_v9, %v2815_v9 }
 0x12d   :  { %3965 = vst.msk [vmem:[%s7604_s4 + $0x90] sm:$0xf] %vm3928_vm3, %v4741_v10  ;;  %4093 = vst.msk [vmem:[%s7604_s4 + $0x290] sm:$0xf] %vm3928_vm3, %v4869_v11  ;;  %v4742_v16 = vpack.c.bf16 %v2685_v12, %v2685_v12  ;;  %v4870_v17 = vpack.c.bf16 %v2813_v13, %v2813_v13  ;;  %v5137_v18 = vpop.f32.mrb[40].mxu0  ;;  %v5265_v19 = vpop.f32.mrb[40].mxu1 }
 0x12e   :  { %3968 = vst.msk [vmem:[%s7604_s4 + $0x9c] sm:$0xf] %vm3928_vm3, %v4744_v14  ;;  %4096 = vst.msk [vmem:[%s7604_s4 + $0x29c] sm:$0xf] %vm3928_vm3, %v4872_v15  ;;  %v2427_v20 = vmul.f32 %v5137_v18, %v5963_v52  ;;  %v2555_v21 = vmul.f32 %v5265_v19, %v5963_v52  ;;  %v1515_v22 = vpop.f32.mrb[41].mxu0  ;;  %v2027_v23 = vpop.f32.mrb[41].mxu1 }
 0x12f   :  { %3966 = vst.msk [vmem:[%s7604_s4 + $0x94] sm:$0xf] %vm3928_vm3, %v4742_v16  ;;  %4094 = vst.msk [vmem:[%s7604_s4 + $0x294] sm:$0xf] %vm3928_vm3, %v4870_v17  ;;  %v2425_v24 = vmul.f32 %v5963_v52, %v1515_v22  ;;  %v2553_v25 = vmul.f32 %v5963_v52, %v2027_v23  ;;  %v5138_v26 = vpop.f32.mrb[42].mxu0  ;;  %v5266_v27 = vpop.f32.mrb[42].mxu1 }
 0x130   :  { %v2690_v28 = vadd.f32 %v5970_v54, %v2427_v20  ;;  %v2818_v29 = vadd.f32 %v5970_v54, %v2555_v21  ;;  %v2428_v30 = vmul.f32 %v5138_v26, %v5963_v52  ;;  %v2556_v31 = vmul.f32 %v5266_v27, %v5963_v52  ;;  %v1518_v32 = vpop.f32.mrb[43].mxu0  ;;  %v2030_v33 = vpop.f32.mrb[43].mxu1  ;;  %v6615_v20 = vld [vmem:[%s7602_s2] ss:$0 sm:$0xff] }
 0x131   :  { %v2688_v34 = vadd.f32 %v5970_v54, %v2425_v24  ;;  %v2816_v35 = vadd.f32 %v5970_v54, %v2553_v25  ;;  %v2426_v36 = vmul.f32 %v5963_v52, %v1518_v32  ;;  %v2554_v37 = vmul.f32 %v5963_v52, %v2030_v33 }
 0x132   :  { %v4747_v38 = vpack.c.bf16 %v2690_v28, %v2690_v28  ;;  %v4875_v39 = vpack.c.bf16 %v2818_v29, %v2818_v29  ;;  %v2691_v40 = vadd.f32 %v5970_v54, %v2428_v30  ;;  %v2819_v41 = vadd.f32 %v5970_v54, %v2556_v31  ;;  %v6632_v29 = vld [vmem:[%s7603_s3] ss:$0 sm:$0xff] }
 0x133   :  { %v4745_v42 = vpack.c.bf16 %v2688_v34, %v2688_v34  ;;  %v4873_v43 = vpack.c.bf16 %v2816_v35, %v2816_v35  ;;  %v2689_v44 = vadd.f32 %v5970_v54, %v2426_v36  ;;  %v2817_v45 = vadd.f32 %v5970_v54, %v2554_v37 }
 0x134   :  { %3971 = vst.msk [vmem:[%s7604_s4 + $0xa8] sm:$0xf] %vm3928_vm3, %v4747_v38  ;;  %4099 = vst.msk [vmem:[%s7604_s4 + $0x2a8] sm:$0xf] %vm3928_vm3, %v4875_v39  ;;  %v4748_v46 = vpack.c.bf16 %v2691_v40, %v2691_v40  ;;  %v4876_v47 = vpack.c.bf16 %v2819_v41, %v2819_v41 }
 0x135   :  { %3969 = vst.msk [vmem:[%s7604_s4 + $0xa0] sm:$0xf] %vm3928_vm3, %v4745_v42  ;;  %4097 = vst.msk [vmem:[%s7604_s4 + $0x2a0] sm:$0xf] %vm3928_vm3, %v4873_v43  ;;  %v4746_v48 = vpack.c.bf16 %v2689_v44, %v2689_v44  ;;  %v4874_v49 = vpack.c.bf16 %v2817_v45, %v2817_v45  ;;  %v5141_v50 = vpop.f32.mrb[44].mxu0  ;;  %v5269_v51 = vpop.f32.mrb[44].mxu1 }
 0x136   :  { %3972 = vst.msk [vmem:[%s7604_s4 + $0xac] sm:$0xf] %vm3928_vm3, %v4748_v46  ;;  %4100 = vst.msk [vmem:[%s7604_s4 + $0x2ac] sm:$0xf] %vm3928_vm3, %v4876_v47  ;;  %v2431_v53 = vmul.f32 %v5141_v50, %v5963_v52  ;;  %v2559_v55 = vmul.f32 %v5269_v51, %v5963_v52  ;;  %v1531_v56 = vpop.f32.mrb[45].mxu0  ;;  %v2043_v57 = vpop.f32.mrb[45].mxu1 }
 0x137   :  { %3970 = vst.msk [vmem:[%s7604_s4 + $0xa4] sm:$0xf] %vm3928_vm3, %v4746_v48  ;;  %4098 = vst.msk [vmem:[%s7604_s4 + $0x2a4] sm:$0xf] %vm3928_vm3, %v4874_v49  ;;  %v2429_v58 = vmul.f32 %v5963_v52, %v1531_v56  ;;  %v2557_v59 = vmul.f32 %v5963_v52, %v2043_v57  ;;  %v5142_v60 = vpop.f32.mrb[46].mxu0  ;;  %v5270_v61 = vpop.f32.mrb[46].mxu1 }
 0x138   :  { %v2694_v62 = vadd.f32 %v5970_v54, %v2431_v53  ;;  %v2822_v63 = vadd.f32 %v5970_v54, %v2559_v55  ;;  %v2432_v0 = vmul.f32 %v5142_v60, %v5963_v52  ;;  %v2560_v1 = vmul.f32 %v5270_v61, %v5963_v52  ;;  %v1534_v2 = vpop.f32.mrb[47].mxu0  ;;  %v2046_v3 = vpop.f32.mrb[47].mxu1 }
 0x139   :  { %v2692_v4 = vadd.f32 %v5970_v54, %v2429_v58  ;;  %v2820_v5 = vadd.f32 %v5970_v54, %v2557_v59  ;;  %v2430_v6 = vmul.f32 %v5963_v52, %v1534_v2  ;;  %v2558_v7 = vmul.f32 %v5963_v52, %v2046_v3 }
 0x13a   :  { %v4751_v8 = vpack.c.bf16 %v2694_v62, %v2694_v62  ;;  %v4879_v9 = vpack.c.bf16 %v2822_v63, %v2822_v63  ;;  %v2695_v10 = vadd.f32 %v5970_v54, %v2432_v0  ;;  %v2823_v11 = vadd.f32 %v5970_v54, %v2560_v1 }
 0x13b   :  { %v4749_v12 = vpack.c.bf16 %v2692_v4, %v2692_v4  ;;  %v4877_v13 = vpack.c.bf16 %v2820_v5, %v2820_v5  ;;  %v2693_v14 = vadd.f32 %v5970_v54, %v2430_v6  ;;  %v2821_v15 = vadd.f32 %v5970_v54, %v2558_v7 }
 0x13c   :  { %3975 = vst.msk [vmem:[%s7604_s4 + $0xb8] sm:$0xf] %vm3928_vm3, %v4751_v8  ;;  %4103 = vst.msk [vmem:[%s7604_s4 + $0x2b8] sm:$0xf] %vm3928_vm3, %v4879_v9  ;;  %v4752_v52 = vpack.c.bf16 %v2695_v10, %v2695_v10  ;;  %v4880_v16 = vpack.c.bf16 %v2823_v11, %v2823_v11 }
 0x13d   :  { %3973 = vst.msk [vmem:[%s7604_s4 + $0xb0] sm:$0xf] %vm3928_vm3, %v4749_v12  ;;  %4101 = vst.msk [vmem:[%s7604_s4 + $0x2b0] sm:$0xf] %vm3928_vm3, %v4877_v13  ;;  %v4750_v54 = vpack.c.bf16 %v2693_v14, %v2693_v14  ;;  %v4878_v17 = vpack.c.bf16 %v2821_v15, %v2821_v15  ;;  %v5145_v18 = vpop.f32.mrb[48].mxu0  ;;  %v5273_v19 = vpop.f32.mrb[48].mxu1 }
 0x13e   :  { %3976 = vst.msk [vmem:[%s7604_s4 + $0xbc] sm:$0xf] %vm3928_vm3, %v4752_v52  ;;  %4104 = vst.msk [vmem:[%s7604_s4 + $0x2bc] sm:$0xf] %vm3928_vm3, %v4880_v16  ;;  %v2435_v21 = vmul.f32 %v6615_v20, %v5145_v18  ;;  %v2563_v22 = vmul.f32 %v6615_v20, %v5273_v19  ;;  %v1547_v23 = vpop.f32.mrb[49].mxu0  ;;  %v2059_v24 = vpop.f32.mrb[49].mxu1 }
 0x13f   :  { %3974 = vst.msk [vmem:[%s7604_s4 + $0xb4] sm:$0xf] %vm3928_vm3, %v4750_v54  ;;  %4102 = vst.msk [vmem:[%s7604_s4 + $0x2b4] sm:$0xf] %vm3928_vm3, %v4878_v17  ;;  %v2433_v25 = vmul.f32 %v6615_v20, %v1547_v23  ;;  %v2561_v26 = vmul.f32 %v6615_v20, %v2059_v24  ;;  %v5146_v27 = vpop.f32.mrb[50].mxu0  ;;  %v5274_v28 = vpop.f32.mrb[50].mxu1 }
 0x140   :  { %v2698_v30 = vadd.f32 %v6632_v29, %v2435_v21  ;;  %v2826_v31 = vadd.f32 %v6632_v29, %v2563_v22  ;;  %v2436_v32 = vmul.f32 %v6615_v20, %v5146_v27  ;;  %v2564_v33 = vmul.f32 %v6615_v20, %v5274_v28  ;;  %v1550_v34 = vpop.f32.mrb[51].mxu0  ;;  %v2062_v35 = vpop.f32.mrb[51].mxu1 }
 0x141   :  { %v2696_v36 = vadd.f32 %v6632_v29, %v2433_v25  ;;  %v2824_v37 = vadd.f32 %v6632_v29, %v2561_v26  ;;  %v2434_v38 = vmul.f32 %v6615_v20, %v1550_v34  ;;  %v2562_v39 = vmul.f32 %v6615_v20, %v2062_v35 }
 0x142   :  { %v4755_v40 = vpack.c.bf16 %v2698_v30, %v2698_v30  ;;  %v4883_v41 = vpack.c.bf16 %v2826_v31, %v2826_v31  ;;  %v2699_v42 = vadd.f32 %v6632_v29, %v2436_v32  ;;  %v2827_v43 = vadd.f32 %v6632_v29, %v2564_v33 }
 0x143   :  { %v4753_v44 = vpack.c.bf16 %v2696_v36, %v2696_v36  ;;  %v4881_v45 = vpack.c.bf16 %v2824_v37, %v2824_v37  ;;  %v2697_v46 = vadd.f32 %v6632_v29, %v2434_v38  ;;  %v2825_v47 = vadd.f32 %v6632_v29, %v2562_v39 }
 0x144   :  { %3979 = vst.msk [vmem:[%s7604_s4 + $0xc8] sm:$0xf] %vm3928_vm3, %v4755_v40  ;;  %4107 = vst.msk [vmem:[%s7604_s4 + $0x2c8] sm:$0xf] %vm3928_vm3, %v4883_v41  ;;  %v4756_v48 = vpack.c.bf16 %v2699_v42, %v2699_v42  ;;  %v4884_v49 = vpack.c.bf16 %v2827_v43, %v2827_v43 }
 0x145   :  { %3977 = vst.msk [vmem:[%s7604_s4 + $0xc0] sm:$0xf] %vm3928_vm3, %v4753_v44  ;;  %4105 = vst.msk [vmem:[%s7604_s4 + $0x2c0] sm:$0xf] %vm3928_vm3, %v4881_v45  ;;  %v4754_v50 = vpack.c.bf16 %v2697_v46, %v2697_v46  ;;  %v4882_v51 = vpack.c.bf16 %v2825_v47, %v2825_v47  ;;  %v5149_v53 = vpop.f32.mrb[52].mxu0  ;;  %v5277_v55 = vpop.f32.mrb[52].mxu1 }
 0x146   :  { %3980 = vst.msk [vmem:[%s7604_s4 + $0xcc] sm:$0xf] %vm3928_vm3, %v4756_v48  ;;  %4108 = vst.msk [vmem:[%s7604_s4 + $0x2cc] sm:$0xf] %vm3928_vm3, %v4884_v49  ;;  %v2439_v56 = vmul.f32 %v6615_v20, %v5149_v53  ;;  %v2567_v57 = vmul.f32 %v6615_v20, %v5277_v55  ;;  %v1563_v58 = vpop.f32.mrb[53].mxu0  ;;  %v2075_v59 = vpop.f32.mrb[53].mxu1 }
 0x147   :  { %3978 = vst.msk [vmem:[%s7604_s4 + $0xc4] sm:$0xf] %vm3928_vm3, %v4754_v50  ;;  %4106 = vst.msk [vmem:[%s7604_s4 + $0x2c4] sm:$0xf] %vm3928_vm3, %v4882_v51  ;;  %v2437_v60 = vmul.f32 %v6615_v20, %v1563_v58  ;;  %v2565_v61 = vmul.f32 %v6615_v20, %v2075_v59  ;;  %v5150_v62 = vpop.f32.mrb[54].mxu0  ;;  %v5278_v63 = vpop.f32.mrb[54].mxu1 }
 0x148   :  { %v2702_v0 = vadd.f32 %v6632_v29, %v2439_v56  ;;  %v2830_v1 = vadd.f32 %v6632_v29, %v2567_v57  ;;  %v2440_v2 = vmul.f32 %v6615_v20, %v5150_v62  ;;  %v2568_v3 = vmul.f32 %v6615_v20, %v5278_v63  ;;  %v1566_v4 = vpop.f32.mrb[55].mxu0  ;;  %v2078_v5 = vpop.f32.mrb[55].mxu1 }
 0x149   :  { %v2700_v6 = vadd.f32 %v6632_v29, %v2437_v60  ;;  %v2828_v7 = vadd.f32 %v6632_v29, %v2565_v61  ;;  %v2438_v8 = vmul.f32 %v6615_v20, %v1566_v4  ;;  %v2566_v9 = vmul.f32 %v6615_v20, %v2078_v5 }
 0x14a   :  { %v4759_v10 = vpack.c.bf16 %v2702_v0, %v2702_v0  ;;  %v4887_v11 = vpack.c.bf16 %v2830_v1, %v2830_v1  ;;  %v2703_v12 = vadd.f32 %v6632_v29, %v2440_v2  ;;  %v2831_v13 = vadd.f32 %v6632_v29, %v2568_v3 }
 0x14b   :  { %v4757_v14 = vpack.c.bf16 %v2700_v6, %v2700_v6  ;;  %v4885_v15 = vpack.c.bf16 %v2828_v7, %v2828_v7  ;;  %v2701_v52 = vadd.f32 %v6632_v29, %v2438_v8  ;;  %v2829_v16 = vadd.f32 %v6632_v29, %v2566_v9 }
 0x14c   :  { %3983 = vst.msk [vmem:[%s7604_s4 + $0xd8] sm:$0xf] %vm3928_vm3, %v4759_v10  ;;  %4111 = vst.msk [vmem:[%s7604_s4 + $0x2d8] sm:$0xf] %vm3928_vm3, %v4887_v11  ;;  %v4760_v54 = vpack.c.bf16 %v2703_v12, %v2703_v12  ;;  %v4888_v17 = vpack.c.bf16 %v2831_v13, %v2831_v13 }
 0x14d   :  { %3981 = vst.msk [vmem:[%s7604_s4 + $0xd0] sm:$0xf] %vm3928_vm3, %v4757_v14  ;;  %4109 = vst.msk [vmem:[%s7604_s4 + $0x2d0] sm:$0xf] %vm3928_vm3, %v4885_v15  ;;  %v4758_v18 = vpack.c.bf16 %v2701_v52, %v2701_v52  ;;  %v4886_v19 = vpack.c.bf16 %v2829_v16, %v2829_v16  ;;  %v5153_v21 = vpop.f32.mrb[56].mxu0  ;;  %v5281_v22 = vpop.f32.mrb[56].mxu1 }
 0x14e   :  { %3984 = vst.msk [vmem:[%s7604_s4 + $0xdc] sm:$0xf] %vm3928_vm3, %v4760_v54  ;;  %4112 = vst.msk [vmem:[%s7604_s4 + $0x2dc] sm:$0xf] %vm3928_vm3, %v4888_v17  ;;  %v2443_v23 = vmul.f32 %v6615_v20, %v5153_v21  ;;  %v2571_v24 = vmul.f32 %v6615_v20, %v5281_v22  ;;  %v1579_v25 = vpop.f32.mrb[57].mxu0  ;;  %v2091_v26 = vpop.f32.mrb[57].mxu1 }
 0x14f   :  { %3982 = vst.msk [vmem:[%s7604_s4 + $0xd4] sm:$0xf] %vm3928_vm3, %v4758_v18  ;;  %4110 = vst.msk [vmem:[%s7604_s4 + $0x2d4] sm:$0xf] %vm3928_vm3, %v4886_v19  ;;  %v2441_v27 = vmul.f32 %v6615_v20, %v1579_v25  ;;  %v2569_v28 = vmul.f32 %v6615_v20, %v2091_v26  ;;  %v5154_v30 = vpop.f32.mrb[58].mxu0  ;;  %v5282_v31 = vpop.f32.mrb[58].mxu1 }
 0x150   :  { %v2706_v32 = vadd.f32 %v6632_v29, %v2443_v23  ;;  %v2834_v33 = vadd.f32 %v6632_v29, %v2571_v24  ;;  %v2444_v34 = vmul.f32 %v6615_v20, %v5154_v30  ;;  %v2572_v35 = vmul.f32 %v6615_v20, %v5282_v31  ;;  %v1582_v36 = vpop.f32.mrb[59].mxu0  ;;  %v2094_v37 = vpop.f32.mrb[59].mxu1 }
 0x151   :  { %v2704_v38 = vadd.f32 %v6632_v29, %v2441_v27  ;;  %v2832_v39 = vadd.f32 %v6632_v29, %v2569_v28  ;;  %v2442_v40 = vmul.f32 %v6615_v20, %v1582_v36  ;;  %v2570_v41 = vmul.f32 %v6615_v20, %v2094_v37 }
 0x152   :  { %v4763_v42 = vpack.c.bf16 %v2706_v32, %v2706_v32  ;;  %v4891_v43 = vpack.c.bf16 %v2834_v33, %v2834_v33  ;;  %v2707_v44 = vadd.f32 %v6632_v29, %v2444_v34  ;;  %v2835_v45 = vadd.f32 %v6632_v29, %v2572_v35 }
 0x153   :  { %v4761_v46 = vpack.c.bf16 %v2704_v38, %v2704_v38  ;;  %v4889_v47 = vpack.c.bf16 %v2832_v39, %v2832_v39  ;;  %v2705_v48 = vadd.f32 %v6632_v29, %v2442_v40  ;;  %v2833_v49 = vadd.f32 %v6632_v29, %v2570_v41 }
 0x154   :  { %3987 = vst.msk [vmem:[%s7604_s4 + $0xe8] sm:$0xf] %vm3928_vm3, %v4763_v42  ;;  %4115 = vst.msk [vmem:[%s7604_s4 + $0x2e8] sm:$0xf] %vm3928_vm3, %v4891_v43  ;;  %v4764_v50 = vpack.c.bf16 %v2707_v44, %v2707_v44  ;;  %v4892_v51 = vpack.c.bf16 %v2835_v45, %v2835_v45 }
 0x155   :  { %3985 = vst.msk [vmem:[%s7604_s4 + $0xe0] sm:$0xf] %vm3928_vm3, %v4761_v46  ;;  %4113 = vst.msk [vmem:[%s7604_s4 + $0x2e0] sm:$0xf] %vm3928_vm3, %v4889_v47  ;;  %v4762_v53 = vpack.c.bf16 %v2705_v48, %v2705_v48  ;;  %v4890_v55 = vpack.c.bf16 %v2833_v49, %v2833_v49  ;;  %v5157_v56 = vpop.f32.mrb[60].mxu0  ;;  %v5285_v57 = vpop.f32.mrb[60].mxu1 }
 0x156   :  { %3988 = vst.msk [vmem:[%s7604_s4 + $0xec] sm:$0xf] %vm3928_vm3, %v4764_v50  ;;  %4116 = vst.msk [vmem:[%s7604_s4 + $0x2ec] sm:$0xf] %vm3928_vm3, %v4892_v51  ;;  %v2447_v58 = vmul.f32 %v6615_v20, %v5157_v56  ;;  %v2575_v59 = vmul.f32 %v6615_v20, %v5285_v57  ;;  %v1595_v60 = vpop.f32.mrb[61].mxu0  ;;  %v2107_v61 = vpop.f32.mrb[61].mxu1 }
 0x157   :  { %3986 = vst.msk [vmem:[%s7604_s4 + $0xe4] sm:$0xf] %vm3928_vm3, %v4762_v53  ;;  %4114 = vst.msk [vmem:[%s7604_s4 + $0x2e4] sm:$0xf] %vm3928_vm3, %v4890_v55  ;;  %v2445_v62 = vmul.f32 %v6615_v20, %v1595_v60  ;;  %v2573_v63 = vmul.f32 %v6615_v20, %v2107_v61  ;;  %v5158_v0 = vpop.f32.mrb[62].mxu0  ;;  %v5286_v1 = vpop.f32.mrb[62].mxu1 }
 0x158   :  { %v2710_v2 = vadd.f32 %v6632_v29, %v2447_v58  ;;  %v2838_v3 = vadd.f32 %v6632_v29, %v2575_v59  ;;  %v2448_v4 = vmul.f32 %v6615_v20, %v5158_v0  ;;  %v2576_v5 = vmul.f32 %v6615_v20, %v5286_v1  ;;  %v1598_v6 = vpop.f32.mrb[63].mxu0  ;;  %v2110_v7 = vpop.f32.mrb[63].mxu1 }
 0x159   :  { %v2708_v8 = vadd.f32 %v6632_v29, %v2445_v62  ;;  %v2836_v9 = vadd.f32 %v6632_v29, %v2573_v63  ;;  %v2446_v10 = vmul.f32 %v6615_v20, %v1598_v6  ;;  %v2574_v11 = vmul.f32 %v6615_v20, %v2110_v7 }
 0x15a   :  { %v4767_v12 = vpack.c.bf16 %v2710_v2, %v2710_v2  ;;  %v4895_v13 = vpack.c.bf16 %v2838_v3, %v2838_v3  ;;  %v2711_v14 = vadd.f32 %v6632_v29, %v2448_v4  ;;  %v2839_v15 = vadd.f32 %v6632_v29, %v2576_v5 }
 0x15b   :  { %v4765_v52 = vpack.c.bf16 %v2708_v8, %v2708_v8  ;;  %v4893_v16 = vpack.c.bf16 %v2836_v9, %v2836_v9  ;;  %v2709_v54 = vadd.f32 %v6632_v29, %v2446_v10  ;;  %v2837_v17 = vadd.f32 %v6632_v29, %v2574_v11 }
 0x15c   :  { %3991 = vst.msk [vmem:[%s7604_s4 + $0xf8] sm:$0xf] %vm3928_vm3, %v4767_v12  ;;  %4119 = vst.msk [vmem:[%s7604_s4 + $0x2f8] sm:$0xf] %vm3928_vm3, %v4895_v13  ;;  %v4768_v18 = vpack.c.bf16 %v2711_v14, %v2711_v14  ;;  %v4896_v19 = vpack.c.bf16 %v2839_v15, %v2839_v15 }
 0x15d   :  { %3989 = vst.msk [vmem:[%s7604_s4 + $0xf0] sm:$0xf] %vm3928_vm3, %v4765_v52  ;;  %4117 = vst.msk [vmem:[%s7604_s4 + $0x2f0] sm:$0xf] %vm3928_vm3, %v4893_v16  ;;  %v4766_v21 = vpack.c.bf16 %v2709_v54, %v2709_v54  ;;  %v4894_v22 = vpack.c.bf16 %v2837_v17, %v2837_v17  ;;  %v5161_v23 = vpop.f32.mrb[64].mxu0  ;;  %v5289_v24 = vpop.f32.mrb[64].mxu1 }
 0x15e   :  { %3992 = vst.msk [vmem:[%s7604_s4 + $0xfc] sm:$0xf] %vm3928_vm3, %v4768_v18  ;;  %4120 = vst.msk [vmem:[%s7604_s4 + $0x2fc] sm:$0xf] %vm3928_vm3, %v4896_v19  ;;  %v2451_v25 = vmul.f32 %v6615_v20, %v5161_v23  ;;  %v2579_v26 = vmul.f32 %v6615_v20, %v5289_v24  ;;  %v1611_v27 = vpop.f32.mrb[65].mxu0  ;;  %v2123_v28 = vpop.f32.mrb[65].mxu1 }
 0x15f   :  { %3990 = vst.msk [vmem:[%s7604_s4 + $0xf4] sm:$0xf] %vm3928_vm3, %v4766_v21  ;;  %4118 = vst.msk [vmem:[%s7604_s4 + $0x2f4] sm:$0xf] %vm3928_vm3, %v4894_v22  ;;  %v2449_v30 = vmul.f32 %v6615_v20, %v1611_v27  ;;  %v2577_v31 = vmul.f32 %v6615_v20, %v2123_v28  ;;  %v5162_v32 = vpop.f32.mrb[66].mxu0  ;;  %v5290_v33 = vpop.f32.mrb[66].mxu1 }
 0x160   :  { %v2714_v34 = vadd.f32 %v6632_v29, %v2451_v25  ;;  %v2842_v35 = vadd.f32 %v6632_v29, %v2579_v26  ;;  %v2452_v36 = vmul.f32 %v6615_v20, %v5162_v32  ;;  %v2580_v37 = vmul.f32 %v6615_v20, %v5290_v33  ;;  %v1614_v38 = vpop.f32.mrb[67].mxu0  ;;  %v2126_v39 = vpop.f32.mrb[67].mxu1 }
 0x161   :  { %v2712_v40 = vadd.f32 %v6632_v29, %v2449_v30  ;;  %v2840_v41 = vadd.f32 %v6632_v29, %v2577_v31  ;;  %v2450_v42 = vmul.f32 %v6615_v20, %v1614_v38  ;;  %v2578_v43 = vmul.f32 %v6615_v20, %v2126_v39 }
 0x162   :  { %v4771_v44 = vpack.c.bf16 %v2714_v34, %v2714_v34  ;;  %v4899_v45 = vpack.c.bf16 %v2842_v35, %v2842_v35  ;;  %v2715_v46 = vadd.f32 %v6632_v29, %v2452_v36  ;;  %v2843_v47 = vadd.f32 %v6632_v29, %v2580_v37 }
 0x163   :  { %v4769_v48 = vpack.c.bf16 %v2712_v40, %v2712_v40  ;;  %v4897_v49 = vpack.c.bf16 %v2840_v41, %v2840_v41  ;;  %v2713_v50 = vadd.f32 %v6632_v29, %v2450_v42  ;;  %v2841_v51 = vadd.f32 %v6632_v29, %v2578_v43 }
 0x164   :  { %3995 = vst.msk [vmem:[%s7604_s4 + $0x108] sm:$0xf] %vm3928_vm3, %v4771_v44  ;;  %4123 = vst.msk [vmem:[%s7604_s4 + $0x308] sm:$0xf] %vm3928_vm3, %v4899_v45  ;;  %v4772_v53 = vpack.c.bf16 %v2715_v46, %v2715_v46  ;;  %v4900_v55 = vpack.c.bf16 %v2843_v47, %v2843_v47 }
 0x165   :  { %3993 = vst.msk [vmem:[%s7604_s4 + $0x100] sm:$0xf] %vm3928_vm3, %v4769_v48  ;;  %4121 = vst.msk [vmem:[%s7604_s4 + $0x300] sm:$0xf] %vm3928_vm3, %v4897_v49  ;;  %v4770_v56 = vpack.c.bf16 %v2713_v50, %v2713_v50  ;;  %v4898_v57 = vpack.c.bf16 %v2841_v51, %v2841_v51  ;;  %v5165_v58 = vpop.f32.mrb[68].mxu0  ;;  %v5293_v59 = vpop.f32.mrb[68].mxu1 }
 0x166   :  { %3996 = vst.msk [vmem:[%s7604_s4 + $0x10c] sm:$0xf] %vm3928_vm3, %v4772_v53  ;;  %4124 = vst.msk [vmem:[%s7604_s4 + $0x30c] sm:$0xf] %vm3928_vm3, %v4900_v55  ;;  %v2455_v60 = vmul.f32 %v6615_v20, %v5165_v58  ;;  %v2583_v61 = vmul.f32 %v6615_v20, %v5293_v59  ;;  %v1627_v62 = vpop.f32.mrb[69].mxu0  ;;  %v2139_v63 = vpop.f32.mrb[69].mxu1 }
 0x167   :  { %3994 = vst.msk [vmem:[%s7604_s4 + $0x104] sm:$0xf] %vm3928_vm3, %v4770_v56  ;;  %4122 = vst.msk [vmem:[%s7604_s4 + $0x304] sm:$0xf] %vm3928_vm3, %v4898_v57  ;;  %v2453_v0 = vmul.f32 %v6615_v20, %v1627_v62  ;;  %v2581_v1 = vmul.f32 %v6615_v20, %v2139_v63  ;;  %v5166_v2 = vpop.f32.mrb[70].mxu0  ;;  %v5294_v3 = vpop.f32.mrb[70].mxu1 }
 0x168   :  { %v2718_v4 = vadd.f32 %v6632_v29, %v2455_v60  ;;  %v2846_v5 = vadd.f32 %v6632_v29, %v2583_v61  ;;  %v2456_v6 = vmul.f32 %v6615_v20, %v5166_v2  ;;  %v2584_v7 = vmul.f32 %v6615_v20, %v5294_v3  ;;  %v1630_v8 = vpop.f32.mrb[71].mxu0  ;;  %v2142_v9 = vpop.f32.mrb[71].mxu1 }
 0x169   :  { %v2716_v10 = vadd.f32 %v6632_v29, %v2453_v0  ;;  %v2844_v11 = vadd.f32 %v6632_v29, %v2581_v1  ;;  %v2454_v12 = vmul.f32 %v6615_v20, %v1630_v8  ;;  %v2582_v13 = vmul.f32 %v6615_v20, %v2142_v9 }
 0x16a   :  { %v4775_v14 = vpack.c.bf16 %v2718_v4, %v2718_v4  ;;  %v4903_v15 = vpack.c.bf16 %v2846_v5, %v2846_v5  ;;  %v2719_v52 = vadd.f32 %v6632_v29, %v2456_v6  ;;  %v2847_v16 = vadd.f32 %v6632_v29, %v2584_v7 }
 0x16b   :  { %v4773_v54 = vpack.c.bf16 %v2716_v10, %v2716_v10  ;;  %v4901_v17 = vpack.c.bf16 %v2844_v11, %v2844_v11  ;;  %v2717_v18 = vadd.f32 %v6632_v29, %v2454_v12  ;;  %v2845_v19 = vadd.f32 %v6632_v29, %v2582_v13 }
 0x16c   :  { %3999 = vst.msk [vmem:[%s7604_s4 + $0x118] sm:$0xf] %vm3928_vm3, %v4775_v14  ;;  %4127 = vst.msk [vmem:[%s7604_s4 + $0x318] sm:$0xf] %vm3928_vm3, %v4903_v15  ;;  %v4776_v21 = vpack.c.bf16 %v2719_v52, %v2719_v52  ;;  %v4904_v22 = vpack.c.bf16 %v2847_v16, %v2847_v16 }
 0x16d   :  { %3997 = vst.msk [vmem:[%s7604_s4 + $0x110] sm:$0xf] %vm3928_vm3, %v4773_v54  ;;  %4125 = vst.msk [vmem:[%s7604_s4 + $0x310] sm:$0xf] %vm3928_vm3, %v4901_v17  ;;  %v4774_v23 = vpack.c.bf16 %v2717_v18, %v2717_v18  ;;  %v4902_v24 = vpack.c.bf16 %v2845_v19, %v2845_v19  ;;  %v5169_v25 = vpop.f32.mrb[72].mxu0  ;;  %v5297_v26 = vpop.f32.mrb[72].mxu1 }
 0x16e   :  { %4000 = vst.msk [vmem:[%s7604_s4 + $0x11c] sm:$0xf] %vm3928_vm3, %v4776_v21  ;;  %4128 = vst.msk [vmem:[%s7604_s4 + $0x31c] sm:$0xf] %vm3928_vm3, %v4904_v22  ;;  %v2459_v27 = vmul.f32 %v6615_v20, %v5169_v25  ;;  %v2587_v28 = vmul.f32 %v6615_v20, %v5297_v26  ;;  %v1643_v30 = vpop.f32.mrb[73].mxu0  ;;  %v2155_v31 = vpop.f32.mrb[73].mxu1 }
 0x16f   :  { %3998 = vst.msk [vmem:[%s7604_s4 + $0x114] sm:$0xf] %vm3928_vm3, %v4774_v23  ;;  %4126 = vst.msk [vmem:[%s7604_s4 + $0x314] sm:$0xf] %vm3928_vm3, %v4902_v24  ;;  %v2457_v32 = vmul.f32 %v6615_v20, %v1643_v30  ;;  %v2585_v33 = vmul.f32 %v6615_v20, %v2155_v31  ;;  %v5170_v34 = vpop.f32.mrb[74].mxu0  ;;  %v5298_v35 = vpop.f32.mrb[74].mxu1 }
 0x170   :  { %v2722_v36 = vadd.f32 %v6632_v29, %v2459_v27  ;;  %v2850_v37 = vadd.f32 %v6632_v29, %v2587_v28  ;;  %v2460_v38 = vmul.f32 %v6615_v20, %v5170_v34  ;;  %v2588_v39 = vmul.f32 %v6615_v20, %v5298_v35  ;;  %v1646_v40 = vpop.f32.mrb[75].mxu0  ;;  %v2158_v41 = vpop.f32.mrb[75].mxu1 }
 0x171   :  { %v2720_v42 = vadd.f32 %v6632_v29, %v2457_v32  ;;  %v2848_v43 = vadd.f32 %v6632_v29, %v2585_v33  ;;  %v2458_v44 = vmul.f32 %v6615_v20, %v1646_v40  ;;  %v2586_v45 = vmul.f32 %v6615_v20, %v2158_v41 }
 0x172   :  { %v4779_v46 = vpack.c.bf16 %v2722_v36, %v2722_v36  ;;  %v4907_v47 = vpack.c.bf16 %v2850_v37, %v2850_v37  ;;  %v2723_v48 = vadd.f32 %v6632_v29, %v2460_v38  ;;  %v2851_v49 = vadd.f32 %v6632_v29, %v2588_v39 }
 0x173   :  { %v4777_v50 = vpack.c.bf16 %v2720_v42, %v2720_v42  ;;  %v4905_v51 = vpack.c.bf16 %v2848_v43, %v2848_v43  ;;  %v2721_v53 = vadd.f32 %v6632_v29, %v2458_v44  ;;  %v2849_v55 = vadd.f32 %v6632_v29, %v2586_v45 }
 0x174   :  { %4003 = vst.msk [vmem:[%s7604_s4 + $0x128] sm:$0xf] %vm3928_vm3, %v4779_v46  ;;  %4131 = vst.msk [vmem:[%s7604_s4 + $0x328] sm:$0xf] %vm3928_vm3, %v4907_v47  ;;  %v4780_v56 = vpack.c.bf16 %v2723_v48, %v2723_v48  ;;  %v4908_v57 = vpack.c.bf16 %v2851_v49, %v2851_v49 }
 0x175   :  { %4001 = vst.msk [vmem:[%s7604_s4 + $0x120] sm:$0xf] %vm3928_vm3, %v4777_v50  ;;  %4129 = vst.msk [vmem:[%s7604_s4 + $0x320] sm:$0xf] %vm3928_vm3, %v4905_v51  ;;  %v4778_v58 = vpack.c.bf16 %v2721_v53, %v2721_v53  ;;  %v4906_v59 = vpack.c.bf16 %v2849_v55, %v2849_v55  ;;  %v5173_v60 = vpop.f32.mrb[76].mxu0  ;;  %v5301_v61 = vpop.f32.mrb[76].mxu1 }
 0x176   :  { %4004 = vst.msk [vmem:[%s7604_s4 + $0x12c] sm:$0xf] %vm3928_vm3, %v4780_v56  ;;  %4132 = vst.msk [vmem:[%s7604_s4 + $0x32c] sm:$0xf] %vm3928_vm3, %v4908_v57  ;;  %v2463_v62 = vmul.f32 %v6615_v20, %v5173_v60  ;;  %v2591_v63 = vmul.f32 %v6615_v20, %v5301_v61  ;;  %v1659_v0 = vpop.f32.mrb[77].mxu0  ;;  %v2171_v1 = vpop.f32.mrb[77].mxu1 }
 0x177   :  { %4002 = vst.msk [vmem:[%s7604_s4 + $0x124] sm:$0xf] %vm3928_vm3, %v4778_v58  ;;  %4130 = vst.msk [vmem:[%s7604_s4 + $0x324] sm:$0xf] %vm3928_vm3, %v4906_v59  ;;  %v2461_v2 = vmul.f32 %v6615_v20, %v1659_v0  ;;  %v2589_v3 = vmul.f32 %v6615_v20, %v2171_v1  ;;  %v5174_v4 = vpop.f32.mrb[78].mxu0  ;;  %v5302_v5 = vpop.f32.mrb[78].mxu1 }
 0x178   :  { %v2726_v6 = vadd.f32 %v6632_v29, %v2463_v62  ;;  %v2854_v7 = vadd.f32 %v6632_v29, %v2591_v63  ;;  %v2464_v8 = vmul.f32 %v6615_v20, %v5174_v4  ;;  %v2592_v9 = vmul.f32 %v6615_v20, %v5302_v5  ;;  %v1662_v10 = vpop.f32.mrb[79].mxu0  ;;  %v2174_v11 = vpop.f32.mrb[79].mxu1 }
 0x179   :  { %v2724_v12 = vadd.f32 %v6632_v29, %v2461_v2  ;;  %v2852_v13 = vadd.f32 %v6632_v29, %v2589_v3  ;;  %v2462_v14 = vmul.f32 %v6615_v20, %v1662_v10  ;;  %v2590_v15 = vmul.f32 %v6615_v20, %v2174_v11 }
 0x17a   :  { %v4783_v52 = vpack.c.bf16 %v2726_v6, %v2726_v6  ;;  %v4911_v16 = vpack.c.bf16 %v2854_v7, %v2854_v7  ;;  %v2727_v54 = vadd.f32 %v6632_v29, %v2464_v8  ;;  %v2855_v17 = vadd.f32 %v6632_v29, %v2592_v9 }
 0x17b   :  { %v4781_v18 = vpack.c.bf16 %v2724_v12, %v2724_v12  ;;  %v4909_v19 = vpack.c.bf16 %v2852_v13, %v2852_v13  ;;  %v2725_v21 = vadd.f32 %v6632_v29, %v2462_v14  ;;  %v2853_v22 = vadd.f32 %v6632_v29, %v2590_v15 }
 0x17c   :  { %4007 = vst.msk [vmem:[%s7604_s4 + $0x138] sm:$0xf] %vm3928_vm3, %v4783_v52  ;;  %4135 = vst.msk [vmem:[%s7604_s4 + $0x338] sm:$0xf] %vm3928_vm3, %v4911_v16  ;;  %v4784_v23 = vpack.c.bf16 %v2727_v54, %v2727_v54  ;;  %v4912_v24 = vpack.c.bf16 %v2855_v17, %v2855_v17 }
 0x17d   :  { %4005 = vst.msk [vmem:[%s7604_s4 + $0x130] sm:$0xf] %vm3928_vm3, %v4781_v18  ;;  %4133 = vst.msk [vmem:[%s7604_s4 + $0x330] sm:$0xf] %vm3928_vm3, %v4909_v19  ;;  %v4782_v25 = vpack.c.bf16 %v2725_v21, %v2725_v21  ;;  %v4910_v26 = vpack.c.bf16 %v2853_v22, %v2853_v22  ;;  %v5177_v27 = vpop.f32.mrb[80].mxu0  ;;  %v5305_v28 = vpop.f32.mrb[80].mxu1 }
 0x17e   :  { %4008 = vst.msk [vmem:[%s7604_s4 + $0x13c] sm:$0xf] %vm3928_vm3, %v4784_v23  ;;  %4136 = vst.msk [vmem:[%s7604_s4 + $0x33c] sm:$0xf] %vm3928_vm3, %v4912_v24  ;;  %v2467_v30 = vmul.f32 %v6615_v20, %v5177_v27  ;;  %v2595_v31 = vmul.f32 %v6615_v20, %v5305_v28  ;;  %v1675_v32 = vpop.f32.mrb[81].mxu0  ;;  %v2187_v33 = vpop.f32.mrb[81].mxu1 }
 0x17f   :  { %4006 = vst.msk [vmem:[%s7604_s4 + $0x134] sm:$0xf] %vm3928_vm3, %v4782_v25  ;;  %4134 = vst.msk [vmem:[%s7604_s4 + $0x334] sm:$0xf] %vm3928_vm3, %v4910_v26  ;;  %v2465_v34 = vmul.f32 %v6615_v20, %v1675_v32  ;;  %v2593_v35 = vmul.f32 %v6615_v20, %v2187_v33  ;;  %v5178_v36 = vpop.f32.mrb[82].mxu0  ;;  %v5306_v37 = vpop.f32.mrb[82].mxu1 }
 0x180   :  { %v2730_v38 = vadd.f32 %v6632_v29, %v2467_v30  ;;  %v2858_v39 = vadd.f32 %v6632_v29, %v2595_v31  ;;  %v2468_v40 = vmul.f32 %v6615_v20, %v5178_v36  ;;  %v2596_v41 = vmul.f32 %v6615_v20, %v5306_v37  ;;  %v1678_v42 = vpop.f32.mrb[83].mxu0  ;;  %v2190_v43 = vpop.f32.mrb[83].mxu1 }
 0x181   :  { %v2728_v44 = vadd.f32 %v6632_v29, %v2465_v34  ;;  %v2856_v45 = vadd.f32 %v6632_v29, %v2593_v35  ;;  %v2466_v46 = vmul.f32 %v6615_v20, %v1678_v42  ;;  %v2594_v47 = vmul.f32 %v6615_v20, %v2190_v43 }
 0x182   :  { %v4787_v48 = vpack.c.bf16 %v2730_v38, %v2730_v38  ;;  %v4915_v49 = vpack.c.bf16 %v2858_v39, %v2858_v39  ;;  %v2731_v50 = vadd.f32 %v6632_v29, %v2468_v40  ;;  %v2859_v51 = vadd.f32 %v6632_v29, %v2596_v41 }
 0x183   :  { %v4785_v53 = vpack.c.bf16 %v2728_v44, %v2728_v44  ;;  %v4913_v55 = vpack.c.bf16 %v2856_v45, %v2856_v45  ;;  %v2729_v56 = vadd.f32 %v6632_v29, %v2466_v46  ;;  %v2857_v57 = vadd.f32 %v6632_v29, %v2594_v47 }
 0x184   :  { %4011 = vst.msk [vmem:[%s7604_s4 + $0x148] sm:$0xf] %vm3928_vm3, %v4787_v48  ;;  %4139 = vst.msk [vmem:[%s7604_s4 + $0x348] sm:$0xf] %vm3928_vm3, %v4915_v49  ;;  %v4788_v58 = vpack.c.bf16 %v2731_v50, %v2731_v50  ;;  %v4916_v59 = vpack.c.bf16 %v2859_v51, %v2859_v51 }
 0x185   :  { %4009 = vst.msk [vmem:[%s7604_s4 + $0x140] sm:$0xf] %vm3928_vm3, %v4785_v53  ;;  %4137 = vst.msk [vmem:[%s7604_s4 + $0x340] sm:$0xf] %vm3928_vm3, %v4913_v55  ;;  %v4786_v60 = vpack.c.bf16 %v2729_v56, %v2729_v56  ;;  %v4914_v61 = vpack.c.bf16 %v2857_v57, %v2857_v57  ;;  %v5181_v62 = vpop.f32.mrb[84].mxu0  ;;  %v5309_v63 = vpop.f32.mrb[84].mxu1 }
 0x186   :  { %4012 = vst.msk [vmem:[%s7604_s4 + $0x14c] sm:$0xf] %vm3928_vm3, %v4788_v58  ;;  %4140 = vst.msk [vmem:[%s7604_s4 + $0x34c] sm:$0xf] %vm3928_vm3, %v4916_v59  ;;  %v2471_v0 = vmul.f32 %v6615_v20, %v5181_v62  ;;  %v2599_v1 = vmul.f32 %v6615_v20, %v5309_v63  ;;  %v1691_v2 = vpop.f32.mrb[85].mxu0  ;;  %v2203_v3 = vpop.f32.mrb[85].mxu1 }
 0x187   :  { %4010 = vst.msk [vmem:[%s7604_s4 + $0x144] sm:$0xf] %vm3928_vm3, %v4786_v60  ;;  %4138 = vst.msk [vmem:[%s7604_s4 + $0x344] sm:$0xf] %vm3928_vm3, %v4914_v61  ;;  %v2469_v4 = vmul.f32 %v6615_v20, %v1691_v2  ;;  %v2597_v5 = vmul.f32 %v6615_v20, %v2203_v3  ;;  %v5182_v6 = vpop.f32.mrb[86].mxu0  ;;  %v5310_v7 = vpop.f32.mrb[86].mxu1 }
 0x188   :  { %v2734_v8 = vadd.f32 %v6632_v29, %v2471_v0  ;;  %v2862_v9 = vadd.f32 %v6632_v29, %v2599_v1  ;;  %v2472_v10 = vmul.f32 %v6615_v20, %v5182_v6  ;;  %v2600_v11 = vmul.f32 %v6615_v20, %v5310_v7  ;;  %v1694_v12 = vpop.f32.mrb[87].mxu0  ;;  %v2206_v13 = vpop.f32.mrb[87].mxu1 }
 0x189   :  { %v2732_v14 = vadd.f32 %v6632_v29, %v2469_v4  ;;  %v2860_v15 = vadd.f32 %v6632_v29, %v2597_v5  ;;  %v2470_v52 = vmul.f32 %v6615_v20, %v1694_v12  ;;  %v2598_v16 = vmul.f32 %v6615_v20, %v2206_v13 }
 0x18a   :  { %v4791_v54 = vpack.c.bf16 %v2734_v8, %v2734_v8  ;;  %v4919_v17 = vpack.c.bf16 %v2862_v9, %v2862_v9  ;;  %v2735_v18 = vadd.f32 %v6632_v29, %v2472_v10  ;;  %v2863_v19 = vadd.f32 %v6632_v29, %v2600_v11 }
 0x18b   :  { %v4789_v21 = vpack.c.bf16 %v2732_v14, %v2732_v14  ;;  %v4917_v22 = vpack.c.bf16 %v2860_v15, %v2860_v15  ;;  %v2733_v23 = vadd.f32 %v6632_v29, %v2470_v52  ;;  %v2861_v24 = vadd.f32 %v6632_v29, %v2598_v16 }
 0x18c   :  { %4015 = vst.msk [vmem:[%s7604_s4 + $0x158] sm:$0xf] %vm3928_vm3, %v4791_v54  ;;  %4143 = vst.msk [vmem:[%s7604_s4 + $0x358] sm:$0xf] %vm3928_vm3, %v4919_v17  ;;  %v4792_v25 = vpack.c.bf16 %v2735_v18, %v2735_v18  ;;  %v4920_v26 = vpack.c.bf16 %v2863_v19, %v2863_v19 }
 0x18d   :  { %4013 = vst.msk [vmem:[%s7604_s4 + $0x150] sm:$0xf] %vm3928_vm3, %v4789_v21  ;;  %4141 = vst.msk [vmem:[%s7604_s4 + $0x350] sm:$0xf] %vm3928_vm3, %v4917_v22  ;;  %v4790_v27 = vpack.c.bf16 %v2733_v23, %v2733_v23  ;;  %v4918_v28 = vpack.c.bf16 %v2861_v24, %v2861_v24  ;;  %v5185_v30 = vpop.f32.mrb[88].mxu0  ;;  %v5313_v31 = vpop.f32.mrb[88].mxu1 }
 0x18e   :  { %4016 = vst.msk [vmem:[%s7604_s4 + $0x15c] sm:$0xf] %vm3928_vm3, %v4792_v25  ;;  %4144 = vst.msk [vmem:[%s7604_s4 + $0x35c] sm:$0xf] %vm3928_vm3, %v4920_v26  ;;  %v2475_v32 = vmul.f32 %v6615_v20, %v5185_v30  ;;  %v2603_v33 = vmul.f32 %v6615_v20, %v5313_v31  ;;  %v1707_v34 = vpop.f32.mrb[89].mxu0  ;;  %v2219_v35 = vpop.f32.mrb[89].mxu1 }
 0x18f   :  { %4014 = vst.msk [vmem:[%s7604_s4 + $0x154] sm:$0xf] %vm3928_vm3, %v4790_v27  ;;  %4142 = vst.msk [vmem:[%s7604_s4 + $0x354] sm:$0xf] %vm3928_vm3, %v4918_v28  ;;  %v2473_v36 = vmul.f32 %v6615_v20, %v1707_v34  ;;  %v2601_v37 = vmul.f32 %v6615_v20, %v2219_v35  ;;  %v5186_v38 = vpop.f32.mrb[90].mxu0  ;;  %v5314_v39 = vpop.f32.mrb[90].mxu1 }
 0x190   :  { %v2738_v40 = vadd.f32 %v6632_v29, %v2475_v32  ;;  %v2866_v41 = vadd.f32 %v6632_v29, %v2603_v33  ;;  %v2476_v42 = vmul.f32 %v6615_v20, %v5186_v38  ;;  %v2604_v43 = vmul.f32 %v6615_v20, %v5314_v39  ;;  %v1710_v44 = vpop.f32.mrb[91].mxu0  ;;  %v2222_v45 = vpop.f32.mrb[91].mxu1 }
 0x191   :  { %v2736_v46 = vadd.f32 %v6632_v29, %v2473_v36  ;;  %v2864_v47 = vadd.f32 %v6632_v29, %v2601_v37  ;;  %v2474_v48 = vmul.f32 %v6615_v20, %v1710_v44  ;;  %v2602_v49 = vmul.f32 %v6615_v20, %v2222_v45 }
 0x192   :  { %v4795_v50 = vpack.c.bf16 %v2738_v40, %v2738_v40  ;;  %v4923_v51 = vpack.c.bf16 %v2866_v41, %v2866_v41  ;;  %v2739_v53 = vadd.f32 %v6632_v29, %v2476_v42  ;;  %v2867_v55 = vadd.f32 %v6632_v29, %v2604_v43 }
 0x193   :  { %v4793_v56 = vpack.c.bf16 %v2736_v46, %v2736_v46  ;;  %v4921_v57 = vpack.c.bf16 %v2864_v47, %v2864_v47  ;;  %v2737_v58 = vadd.f32 %v6632_v29, %v2474_v48  ;;  %v2865_v59 = vadd.f32 %v6632_v29, %v2602_v49 }
 0x194   :  { %4019 = vst.msk [vmem:[%s7604_s4 + $0x168] sm:$0xf] %vm3928_vm3, %v4795_v50  ;;  %4147 = vst.msk [vmem:[%s7604_s4 + $0x368] sm:$0xf] %vm3928_vm3, %v4923_v51  ;;  %v4796_v60 = vpack.c.bf16 %v2739_v53, %v2739_v53  ;;  %v4924_v61 = vpack.c.bf16 %v2867_v55, %v2867_v55 }
 0x195   :  { %4017 = vst.msk [vmem:[%s7604_s4 + $0x160] sm:$0xf] %vm3928_vm3, %v4793_v56  ;;  %4145 = vst.msk [vmem:[%s7604_s4 + $0x360] sm:$0xf] %vm3928_vm3, %v4921_v57  ;;  %v4794_v62 = vpack.c.bf16 %v2737_v58, %v2737_v58  ;;  %v4922_v63 = vpack.c.bf16 %v2865_v59, %v2865_v59  ;;  %v5189_v0 = vpop.f32.mrb[92].mxu0  ;;  %v5317_v1 = vpop.f32.mrb[92].mxu1 }
 0x196   :  { %4020 = vst.msk [vmem:[%s7604_s4 + $0x16c] sm:$0xf] %vm3928_vm3, %v4796_v60  ;;  %4148 = vst.msk [vmem:[%s7604_s4 + $0x36c] sm:$0xf] %vm3928_vm3, %v4924_v61  ;;  %v2479_v2 = vmul.f32 %v6615_v20, %v5189_v0  ;;  %v2607_v3 = vmul.f32 %v6615_v20, %v5317_v1  ;;  %v1723_v4 = vpop.f32.mrb[93].mxu0  ;;  %v2235_v5 = vpop.f32.mrb[93].mxu1 }
 0x197   :  { %4018 = vst.msk [vmem:[%s7604_s4 + $0x164] sm:$0xf] %vm3928_vm3, %v4794_v62  ;;  %4146 = vst.msk [vmem:[%s7604_s4 + $0x364] sm:$0xf] %vm3928_vm3, %v4922_v63  ;;  %v2477_v6 = vmul.f32 %v6615_v20, %v1723_v4  ;;  %v2605_v7 = vmul.f32 %v6615_v20, %v2235_v5  ;;  %v5190_v8 = vpop.f32.mrb[94].mxu0  ;;  %v5318_v9 = vpop.f32.mrb[94].mxu1 }
 0x198   :  { %v2742_v10 = vadd.f32 %v6632_v29, %v2479_v2  ;;  %v2870_v11 = vadd.f32 %v6632_v29, %v2607_v3  ;;  %v2480_v12 = vmul.f32 %v6615_v20, %v5190_v8  ;;  %v2608_v13 = vmul.f32 %v6615_v20, %v5318_v9  ;;  %v1726_v14 = vpop.f32.mrb[95].mxu0  ;;  %v2238_v15 = vpop.f32.mrb[95].mxu1  ;;  %v7249_v2 = vld [vmem:[%s7602_s2] ss:$0 sm:$0xff] }
 0x199   :  { %v2740_v52 = vadd.f32 %v6632_v29, %v2477_v6  ;;  %v2868_v16 = vadd.f32 %v6632_v29, %v2605_v7  ;;  %v2478_v54 = vmul.f32 %v6615_v20, %v1726_v14  ;;  %v2606_v17 = vmul.f32 %v6615_v20, %v2238_v15 }
 0x19a   :  { %v4799_v18 = vpack.c.bf16 %v2742_v10, %v2742_v10  ;;  %v4927_v19 = vpack.c.bf16 %v2870_v11, %v2870_v11  ;;  %v2743_v21 = vadd.f32 %v6632_v29, %v2480_v12  ;;  %v2871_v22 = vadd.f32 %v6632_v29, %v2608_v13  ;;  %v7266_v11 = vld [vmem:[%s7603_s3] ss:$0 sm:$0xff] }
 0x19b   :  { %v4797_v23 = vpack.c.bf16 %v2740_v52, %v2740_v52  ;;  %v4925_v24 = vpack.c.bf16 %v2868_v16, %v2868_v16  ;;  %v2741_v25 = vadd.f32 %v6632_v29, %v2478_v54  ;;  %v2869_v26 = vadd.f32 %v6632_v29, %v2606_v17 }
 0x19c   :  { %4023 = vst.msk [vmem:[%s7604_s4 + $0x178] sm:$0xf] %vm3928_vm3, %v4799_v18  ;;  %4151 = vst.msk [vmem:[%s7604_s4 + $0x378] sm:$0xf] %vm3928_vm3, %v4927_v19  ;;  %v4800_v27 = vpack.c.bf16 %v2743_v21, %v2743_v21  ;;  %v4928_v28 = vpack.c.bf16 %v2871_v22, %v2871_v22 }
 0x19d   :  { %4021 = vst.msk [vmem:[%s7604_s4 + $0x170] sm:$0xf] %vm3928_vm3, %v4797_v23  ;;  %4149 = vst.msk [vmem:[%s7604_s4 + $0x370] sm:$0xf] %vm3928_vm3, %v4925_v24  ;;  %v4798_v30 = vpack.c.bf16 %v2741_v25, %v2741_v25  ;;  %v4926_v31 = vpack.c.bf16 %v2869_v26, %v2869_v26  ;;  %v5193_v32 = vpop.f32.mrb[96].mxu0  ;;  %v5321_v33 = vpop.f32.mrb[96].mxu1 }
 0x19e   :  { %4024 = vst.msk [vmem:[%s7604_s4 + $0x17c] sm:$0xf] %vm3928_vm3, %v4800_v27  ;;  %4152 = vst.msk [vmem:[%s7604_s4 + $0x37c] sm:$0xf] %vm3928_vm3, %v4928_v28  ;;  %v2483_v34 = vmul.f32 %v6615_v20, %v5193_v32  ;;  %v2611_v35 = vmul.f32 %v6615_v20, %v5321_v33  ;;  %v1739_v36 = vpop.f32.mrb[97].mxu0  ;;  %v2251_v37 = vpop.f32.mrb[97].mxu1 }
 0x19f   :  { %4022 = vst.msk [vmem:[%s7604_s4 + $0x174] sm:$0xf] %vm3928_vm3, %v4798_v30  ;;  %4150 = vst.msk [vmem:[%s7604_s4 + $0x374] sm:$0xf] %vm3928_vm3, %v4926_v31  ;;  %v2481_v38 = vmul.f32 %v6615_v20, %v1739_v36  ;;  %v2609_v39 = vmul.f32 %v6615_v20, %v2251_v37  ;;  %v5194_v40 = vpop.f32.mrb[98].mxu0  ;;  %v5322_v41 = vpop.f32.mrb[98].mxu1 }
 0x1a0   :  { %v2746_v42 = vadd.f32 %v6632_v29, %v2483_v34  ;;  %v2874_v43 = vadd.f32 %v6632_v29, %v2611_v35  ;;  %v2484_v44 = vmul.f32 %v6615_v20, %v5194_v40  ;;  %v2612_v45 = vmul.f32 %v6615_v20, %v5322_v41  ;;  %v1742_v46 = vpop.f32.mrb[99].mxu0  ;;  %v2254_v47 = vpop.f32.mrb[99].mxu1 }
 0x1a1   :  { %v2744_v48 = vadd.f32 %v6632_v29, %v2481_v38  ;;  %v2872_v49 = vadd.f32 %v6632_v29, %v2609_v39  ;;  %v2482_v50 = vmul.f32 %v6615_v20, %v1742_v46  ;;  %v2610_v51 = vmul.f32 %v6615_v20, %v2254_v47 }
 0x1a2   :  { %v4803_v53 = vpack.c.bf16 %v2746_v42, %v2746_v42  ;;  %v4931_v55 = vpack.c.bf16 %v2874_v43, %v2874_v43  ;;  %v2747_v56 = vadd.f32 %v6632_v29, %v2484_v44  ;;  %v2875_v57 = vadd.f32 %v6632_v29, %v2612_v45 }
 0x1a3   :  { %v4801_v58 = vpack.c.bf16 %v2744_v48, %v2744_v48  ;;  %v4929_v59 = vpack.c.bf16 %v2872_v49, %v2872_v49  ;;  %v2745_v60 = vadd.f32 %v6632_v29, %v2482_v50  ;;  %v2873_v61 = vadd.f32 %v6632_v29, %v2610_v51 }
 0x1a4   :  { %4027 = vst.msk [vmem:[%s7604_s4 + $0x188] sm:$0xf] %vm3928_vm3, %v4803_v53  ;;  %4155 = vst.msk [vmem:[%s7604_s4 + $0x388] sm:$0xf] %vm3928_vm3, %v4931_v55  ;;  %v4804_v20 = vpack.c.bf16 %v2747_v56, %v2747_v56  ;;  %v4932_v62 = vpack.c.bf16 %v2875_v57, %v2875_v57 }
 0x1a5   :  { %4025 = vst.msk [vmem:[%s7604_s4 + $0x180] sm:$0xf] %vm3928_vm3, %v4801_v58  ;;  %4153 = vst.msk [vmem:[%s7604_s4 + $0x380] sm:$0xf] %vm3928_vm3, %v4929_v59  ;;  %v4802_v29 = vpack.c.bf16 %v2745_v60, %v2745_v60  ;;  %v4930_v63 = vpack.c.bf16 %v2873_v61, %v2873_v61  ;;  %v5197_v0 = vpop.f32.mrb[100].mxu0  ;;  %v5325_v1 = vpop.f32.mrb[100].mxu1 }
 0x1a6   :  { %4028 = vst.msk [vmem:[%s7604_s4 + $0x18c] sm:$0xf] %vm3928_vm3, %v4804_v20  ;;  %4156 = vst.msk [vmem:[%s7604_s4 + $0x38c] sm:$0xf] %vm3928_vm3, %v4932_v62  ;;  %v2487_v3 = vmul.f32 %v7249_v2, %v5197_v0  ;;  %v2615_v4 = vmul.f32 %v7249_v2, %v5325_v1  ;;  %v1755_v5 = vpop.f32.mrb[101].mxu0  ;;  %v2267_v6 = vpop.f32.mrb[101].mxu1 }
 0x1a7   :  { %4026 = vst.msk [vmem:[%s7604_s4 + $0x184] sm:$0xf] %vm3928_vm3, %v4802_v29  ;;  %4154 = vst.msk [vmem:[%s7604_s4 + $0x384] sm:$0xf] %vm3928_vm3, %v4930_v63  ;;  %v2485_v7 = vmul.f32 %v7249_v2, %v1755_v5  ;;  %v2613_v8 = vmul.f32 %v7249_v2, %v2267_v6  ;;  %v5198_v9 = vpop.f32.mrb[102].mxu0  ;;  %v5326_v10 = vpop.f32.mrb[102].mxu1 }
 0x1a8   :  { %v2750_v12 = vadd.f32 %v7266_v11, %v2487_v3  ;;  %v2878_v13 = vadd.f32 %v7266_v11, %v2615_v4  ;;  %v2488_v14 = vmul.f32 %v7249_v2, %v5198_v9  ;;  %v2616_v15 = vmul.f32 %v7249_v2, %v5326_v10  ;;  %v1758_v52 = vpop.f32.mrb[103].mxu0  ;;  %v2270_v16 = vpop.f32.mrb[103].mxu1 }
 0x1a9   :  { %v2748_v54 = vadd.f32 %v7266_v11, %v2485_v7  ;;  %v2876_v17 = vadd.f32 %v7266_v11, %v2613_v8  ;;  %v2486_v18 = vmul.f32 %v7249_v2, %v1758_v52  ;;  %v2614_v19 = vmul.f32 %v7249_v2, %v2270_v16 }
 0x1aa   :  { %v4807_v21 = vpack.c.bf16 %v2750_v12, %v2750_v12  ;;  %v4935_v22 = vpack.c.bf16 %v2878_v13, %v2878_v13  ;;  %v2751_v23 = vadd.f32 %v7266_v11, %v2488_v14  ;;  %v2879_v24 = vadd.f32 %v7266_v11, %v2616_v15 }
 0x1ab   :  { %v4805_v25 = vpack.c.bf16 %v2748_v54, %v2748_v54  ;;  %v4933_v26 = vpack.c.bf16 %v2876_v17, %v2876_v17  ;;  %v2749_v27 = vadd.f32 %v7266_v11, %v2486_v18  ;;  %v2877_v28 = vadd.f32 %v7266_v11, %v2614_v19 }
 0x1ac   :  { %4031 = vst.msk [vmem:[%s7604_s4 + $0x198] sm:$0xf] %vm3928_vm3, %v4807_v21  ;;  %4159 = vst.msk [vmem:[%s7604_s4 + $0x398] sm:$0xf] %vm3928_vm3, %v4935_v22  ;;  %v4808_v30 = vpack.c.bf16 %v2751_v23, %v2751_v23  ;;  %v4936_v31 = vpack.c.bf16 %v2879_v24, %v2879_v24 }
 0x1ad   :  { %4029 = vst.msk [vmem:[%s7604_s4 + $0x190] sm:$0xf] %vm3928_vm3, %v4805_v25  ;;  %4157 = vst.msk [vmem:[%s7604_s4 + $0x390] sm:$0xf] %vm3928_vm3, %v4933_v26  ;;  %v4806_v32 = vpack.c.bf16 %v2749_v27, %v2749_v27  ;;  %v4934_v33 = vpack.c.bf16 %v2877_v28, %v2877_v28  ;;  %v5201_v34 = vpop.f32.mrb[104].mxu0  ;;  %v5329_v35 = vpop.f32.mrb[104].mxu1 }
 0x1ae   :  { %4032 = vst.msk [vmem:[%s7604_s4 + $0x19c] sm:$0xf] %vm3928_vm3, %v4808_v30  ;;  %4160 = vst.msk [vmem:[%s7604_s4 + $0x39c] sm:$0xf] %vm3928_vm3, %v4936_v31  ;;  %v2491_v36 = vmul.f32 %v7249_v2, %v5201_v34  ;;  %v2619_v37 = vmul.f32 %v7249_v2, %v5329_v35  ;;  %v1771_v38 = vpop.f32.mrb[105].mxu0  ;;  %v2283_v39 = vpop.f32.mrb[105].mxu1 }
 0x1af   :  { %4030 = vst.msk [vmem:[%s7604_s4 + $0x194] sm:$0xf] %vm3928_vm3, %v4806_v32  ;;  %4158 = vst.msk [vmem:[%s7604_s4 + $0x394] sm:$0xf] %vm3928_vm3, %v4934_v33  ;;  %v2489_v40 = vmul.f32 %v7249_v2, %v1771_v38  ;;  %v2617_v41 = vmul.f32 %v7249_v2, %v2283_v39  ;;  %v5202_v42 = vpop.f32.mrb[106].mxu0  ;;  %v5330_v43 = vpop.f32.mrb[106].mxu1 }
 0x1b0   :  { %v2754_v44 = vadd.f32 %v7266_v11, %v2491_v36  ;;  %v2882_v45 = vadd.f32 %v7266_v11, %v2619_v37  ;;  %v2492_v46 = vmul.f32 %v7249_v2, %v5202_v42  ;;  %v2620_v47 = vmul.f32 %v7249_v2, %v5330_v43  ;;  %v1774_v48 = vpop.f32.mrb[107].mxu0  ;;  %v2286_v49 = vpop.f32.mrb[107].mxu1 }
 0x1b1   :  { %v2752_v50 = vadd.f32 %v7266_v11, %v2489_v40  ;;  %v2880_v51 = vadd.f32 %v7266_v11, %v2617_v41  ;;  %v2490_v53 = vmul.f32 %v7249_v2, %v1774_v48  ;;  %v2618_v55 = vmul.f32 %v7249_v2, %v2286_v49 }
 0x1b2   :  { %v4811_v56 = vpack.c.bf16 %v2754_v44, %v2754_v44  ;;  %v4939_v57 = vpack.c.bf16 %v2882_v45, %v2882_v45  ;;  %v2755_v58 = vadd.f32 %v7266_v11, %v2492_v46  ;;  %v2883_v59 = vadd.f32 %v7266_v11, %v2620_v47 }
 0x1b3   :  { %v4809_v60 = vpack.c.bf16 %v2752_v50, %v2752_v50  ;;  %v4937_v61 = vpack.c.bf16 %v2880_v51, %v2880_v51  ;;  %v2753_v20 = vadd.f32 %v7266_v11, %v2490_v53  ;;  %v2881_v62 = vadd.f32 %v7266_v11, %v2618_v55 }
 0x1b4   :  { %4035 = vst.msk [vmem:[%s7604_s4 + $0x1a8] sm:$0xf] %vm3928_vm3, %v4811_v56  ;;  %4163 = vst.msk [vmem:[%s7604_s4 + $0x3a8] sm:$0xf] %vm3928_vm3, %v4939_v57  ;;  %v4812_v29 = vpack.c.bf16 %v2755_v58, %v2755_v58  ;;  %v4940_v63 = vpack.c.bf16 %v2883_v59, %v2883_v59 }
 0x1b5   :  { %4033 = vst.msk [vmem:[%s7604_s4 + $0x1a0] sm:$0xf] %vm3928_vm3, %v4809_v60  ;;  %4161 = vst.msk [vmem:[%s7604_s4 + $0x3a0] sm:$0xf] %vm3928_vm3, %v4937_v61  ;;  %v4810_v0 = vpack.c.bf16 %v2753_v20, %v2753_v20  ;;  %v4938_v1 = vpack.c.bf16 %v2881_v62, %v2881_v62  ;;  %v5205_v3 = vpop.f32.mrb[108].mxu0 }
 0x1b6   :  { %4036 = vst.msk [vmem:[%s7604_s4 + $0x1ac] sm:$0xf] %vm3928_vm3, %v4812_v29  ;;  %4164 = vst.msk [vmem:[%s7604_s4 + $0x3ac] sm:$0xf] %vm3928_vm3, %v4940_v63  ;;  %v2495_v4 = vmul.f32 %v7249_v2, %v5205_v3  ;;  %v5333_v5 = vpop.f32.mrb[108].mxu1  ;;  %v1787_v6 = vpop.f32.mrb[109].mxu0 }
 0x1b7   :  { %4034 = vst.msk [vmem:[%s7604_s4 + $0x1a4] sm:$0xf] %vm3928_vm3, %v4810_v0  ;;  %4162 = vst.msk [vmem:[%s7604_s4 + $0x3a4] sm:$0xf] %vm3928_vm3, %v4938_v1  ;;  %v2623_v7 = vmul.f32 %v7249_v2, %v5333_v5  ;;  %v2493_v8 = vmul.f32 %v7249_v2, %v1787_v6  ;;  %v2299_v9 = vpop.f32.mrb[109].mxu1  ;;  %v5206_v10 = vpop.f32.mrb[110].mxu0 }
 0x1b8   :  { %v2758_v12 = vadd.f32 %v7266_v11, %v2495_v4  ;;  %v2621_v13 = vmul.f32 %v7249_v2, %v2299_v9  ;;  %v2496_v14 = vmul.f32 %v7249_v2, %v5206_v10  ;;  %v5334_v15 = vpop.f32.mrb[110].mxu1  ;;  %v1790_v52 = vpop.f32.mrb[111].mxu0 }
 0x1b9   :  { %v2886_v16 = vadd.f32 %v7266_v11, %v2623_v7  ;;  %v2756_v54 = vadd.f32 %v7266_v11, %v2493_v8  ;;  %v2624_v17 = vmul.f32 %v7249_v2, %v5334_v15  ;;  %v2494_v18 = vmul.f32 %v7249_v2, %v1790_v52  ;;  %v2302_v19 = vpop.f32.mrb[111].mxu1 }
 0x1ba   :  { %v4815_v21 = vpack.c.bf16 %v2758_v12, %v2758_v12  ;;  %v2884_v22 = vadd.f32 %v7266_v11, %v2621_v13  ;;  %v2759_v23 = vadd.f32 %v7266_v11, %v2496_v14  ;;  %v2622_v24 = vmul.f32 %v7249_v2, %v2302_v19 }
 0x1bb   :  { %v4943_v25 = vpack.c.bf16 %v2886_v16, %v2886_v16  ;;  %v4813_v26 = vpack.c.bf16 %v2756_v54, %v2756_v54  ;;  %v2887_v27 = vadd.f32 %v7266_v11, %v2624_v17  ;;  %v2757_v28 = vadd.f32 %v7266_v11, %v2494_v18 }
 0x1bc   :  { %4039 = vst.msk [vmem:[%s7604_s4 + $0x1b8] sm:$0xf] %vm3928_vm3, %v4815_v21  ;;  %v4941_v30 = vpack.c.bf16 %v2884_v22, %v2884_v22  ;;  %v4816_v31 = vpack.c.bf16 %v2759_v23, %v2759_v23  ;;  %v2885_v32 = vadd.f32 %v7266_v11, %v2622_v24 }
 0x1bd   :  { %4167 = vst.msk [vmem:[%s7604_s4 + $0x3b8] sm:$0xf] %vm3928_vm3, %v4943_v25  ;;  %4037 = vst.msk [vmem:[%s7604_s4 + $0x1b0] sm:$0xf] %vm3928_vm3, %v4813_v26  ;;  %v4944_v33 = vpack.c.bf16 %v2887_v27, %v2887_v27  ;;  %v4814_v34 = vpack.c.bf16 %v2757_v28, %v2757_v28  ;;  %v5209_v35 = vpop.f32.mrb[112].mxu0 }
 0x1be   :  { %4165 = vst.msk [vmem:[%s7604_s4 + $0x3b0] sm:$0xf] %vm3928_vm3, %v4941_v30  ;;  %4040 = vst.msk [vmem:[%s7604_s4 + $0x1bc] sm:$0xf] %vm3928_vm3, %v4816_v31  ;;  %v4942_v36 = vpack.c.bf16 %v2885_v32, %v2885_v32  ;;  %v2499_v37 = vmul.f32 %v7249_v2, %v5209_v35  ;;  %v5337_v38 = vpop.f32.mrb[112].mxu1  ;;  %v1803_v39 = vpop.f32.mrb[113].mxu0 }
 0x1bf   :  { %4168 = vst.msk [vmem:[%s7604_s4 + $0x3bc] sm:$0xf] %vm3928_vm3, %v4944_v33  ;;  %4038 = vst.msk [vmem:[%s7604_s4 + $0x1b4] sm:$0xf] %vm3928_vm3, %v4814_v34  ;;  %v2627_v40 = vmul.f32 %v7249_v2, %v5337_v38  ;;  %v2497_v41 = vmul.f32 %v7249_v2, %v1803_v39  ;;  %v2315_v42 = vpop.f32.mrb[113].mxu1  ;;  %v5210_v43 = vpop.f32.mrb[114].mxu0 }
 0x1c0   :  { %4166 = vst.msk [vmem:[%s7604_s4 + $0x3b4] sm:$0xf] %vm3928_vm3, %v4942_v36  ;;  %v2762_v44 = vadd.f32 %v7266_v11, %v2499_v37  ;;  %v2625_v45 = vmul.f32 %v7249_v2, %v2315_v42  ;;  %v2500_v46 = vmul.f32 %v7249_v2, %v5210_v43  ;;  %v5338_v47 = vpop.f32.mrb[114].mxu1  ;;  %v1806_v48 = vpop.f32.mrb[115].mxu0 }
 0x1c1   :  { %v2890_v49 = vadd.f32 %v7266_v11, %v2627_v40  ;;  %v2760_v50 = vadd.f32 %v7266_v11, %v2497_v41  ;;  %v2628_v51 = vmul.f32 %v7249_v2, %v5338_v47  ;;  %v2498_v53 = vmul.f32 %v7249_v2, %v1806_v48  ;;  %v2318_v55 = vpop.f32.mrb[115].mxu1 }
 0x1c2   :  { %v4819_v56 = vpack.c.bf16 %v2762_v44, %v2762_v44  ;;  %v2888_v57 = vadd.f32 %v7266_v11, %v2625_v45  ;;  %v2763_v58 = vadd.f32 %v7266_v11, %v2500_v46  ;;  %v2626_v59 = vmul.f32 %v7249_v2, %v2318_v55 }
 0x1c3   :  { %v4947_v60 = vpack.c.bf16 %v2890_v49, %v2890_v49  ;;  %v4817_v61 = vpack.c.bf16 %v2760_v50, %v2760_v50  ;;  %v2891_v20 = vadd.f32 %v7266_v11, %v2628_v51  ;;  %v2761_v62 = vadd.f32 %v7266_v11, %v2498_v53 }
 0x1c4   :  { %4043 = vst.msk [vmem:[%s7604_s4 + $0x1c8] sm:$0xf] %vm3928_vm3, %v4819_v56  ;;  %v4945_v29 = vpack.c.bf16 %v2888_v57, %v2888_v57  ;;  %v4820_v63 = vpack.c.bf16 %v2763_v58, %v2763_v58  ;;  %v2889_v0 = vadd.f32 %v7266_v11, %v2626_v59 }
 0x1c5   :  { %4171 = vst.msk [vmem:[%s7604_s4 + $0x3c8] sm:$0xf] %vm3928_vm3, %v4947_v60  ;;  %4041 = vst.msk [vmem:[%s7604_s4 + $0x1c0] sm:$0xf] %vm3928_vm3, %v4817_v61  ;;  %v4948_v1 = vpack.c.bf16 %v2891_v20, %v2891_v20  ;;  %v4818_v3 = vpack.c.bf16 %v2761_v62, %v2761_v62  ;;  %v5213_v4 = vpop.f32.mrb[116].mxu0 }
 0x1c6   :  { %4169 = vst.msk [vmem:[%s7604_s4 + $0x3c0] sm:$0xf] %vm3928_vm3, %v4945_v29  ;;  %4044 = vst.msk [vmem:[%s7604_s4 + $0x1cc] sm:$0xf] %vm3928_vm3, %v4820_v63  ;;  %v4946_v5 = vpack.c.bf16 %v2889_v0, %v2889_v0  ;;  %v2503_v6 = vmul.f32 %v7249_v2, %v5213_v4  ;;  %v5341_v7 = vpop.f32.mrb[116].mxu1  ;;  %v1819_v8 = vpop.f32.mrb[117].mxu0 }
 0x1c7   :  { %4172 = vst.msk [vmem:[%s7604_s4 + $0x3cc] sm:$0xf] %vm3928_vm3, %v4948_v1  ;;  %4042 = vst.msk [vmem:[%s7604_s4 + $0x1c4] sm:$0xf] %vm3928_vm3, %v4818_v3  ;;  %v2631_v9 = vmul.f32 %v7249_v2, %v5341_v7  ;;  %v2501_v10 = vmul.f32 %v7249_v2, %v1819_v8  ;;  %v2331_v12 = vpop.f32.mrb[117].mxu1  ;;  %v5214_v13 = vpop.f32.mrb[118].mxu0 }
 0x1c8   :  { %4170 = vst.msk [vmem:[%s7604_s4 + $0x3c4] sm:$0xf] %vm3928_vm3, %v4946_v5  ;;  %v2766_v14 = vadd.f32 %v7266_v11, %v2503_v6  ;;  %v2629_v15 = vmul.f32 %v7249_v2, %v2331_v12  ;;  %v2504_v52 = vmul.f32 %v7249_v2, %v5214_v13  ;;  %v5342_v16 = vpop.f32.mrb[118].mxu1  ;;  %v1822_v54 = vpop.f32.mrb[119].mxu0 }
 0x1c9   :  { %v2894_v17 = vadd.f32 %v7266_v11, %v2631_v9  ;;  %v2764_v18 = vadd.f32 %v7266_v11, %v2501_v10  ;;  %v2632_v19 = vmul.f32 %v7249_v2, %v5342_v16  ;;  %v2502_v21 = vmul.f32 %v7249_v2, %v1822_v54  ;;  %v2334_v22 = vpop.f32.mrb[119].mxu1 }
 0x1ca   :  { %v4823_v23 = vpack.c.bf16 %v2766_v14, %v2766_v14  ;;  %v2892_v24 = vadd.f32 %v7266_v11, %v2629_v15  ;;  %v2767_v25 = vadd.f32 %v7266_v11, %v2504_v52  ;;  %v2630_v26 = vmul.f32 %v7249_v2, %v2334_v22 }
 0x1cb   :  { %v4951_v27 = vpack.c.bf16 %v2894_v17, %v2894_v17  ;;  %v4821_v28 = vpack.c.bf16 %v2764_v18, %v2764_v18  ;;  %v2895_v30 = vadd.f32 %v7266_v11, %v2632_v19  ;;  %v2765_v31 = vadd.f32 %v7266_v11, %v2502_v21 }
 0x1cc   :  { %4047 = vst.msk [vmem:[%s7604_s4 + $0x1d8] sm:$0xf] %vm3928_vm3, %v4823_v23  ;;  %v4949_v32 = vpack.c.bf16 %v2892_v24, %v2892_v24  ;;  %v4824_v33 = vpack.c.bf16 %v2767_v25, %v2767_v25  ;;  %v2893_v34 = vadd.f32 %v7266_v11, %v2630_v26 }
 0x1cd   :  { %4175 = vst.msk [vmem:[%s7604_s4 + $0x3d8] sm:$0xf] %vm3928_vm3, %v4951_v27  ;;  %4045 = vst.msk [vmem:[%s7604_s4 + $0x1d0] sm:$0xf] %vm3928_vm3, %v4821_v28  ;;  %v4952_v35 = vpack.c.bf16 %v2895_v30, %v2895_v30  ;;  %v4822_v36 = vpack.c.bf16 %v2765_v31, %v2765_v31  ;;  %v5217_v37 = vpop.f32.mrb[120].mxu0 }
 0x1ce   :  { %4173 = vst.msk [vmem:[%s7604_s4 + $0x3d0] sm:$0xf] %vm3928_vm3, %v4949_v32  ;;  %4048 = vst.msk [vmem:[%s7604_s4 + $0x1dc] sm:$0xf] %vm3928_vm3, %v4824_v33  ;;  %v4950_v38 = vpack.c.bf16 %v2893_v34, %v2893_v34  ;;  %v2507_v39 = vmul.f32 %v7249_v2, %v5217_v37  ;;  %v5345_v40 = vpop.f32.mrb[120].mxu1  ;;  %v1835_v41 = vpop.f32.mrb[121].mxu0 }
 0x1cf   :  { %4176 = vst.msk [vmem:[%s7604_s4 + $0x3dc] sm:$0xf] %vm3928_vm3, %v4952_v35  ;;  %4046 = vst.msk [vmem:[%s7604_s4 + $0x1d4] sm:$0xf] %vm3928_vm3, %v4822_v36  ;;  %v2635_v42 = vmul.f32 %v7249_v2, %v5345_v40  ;;  %v2505_v43 = vmul.f32 %v7249_v2, %v1835_v41  ;;  %v2347_v44 = vpop.f32.mrb[121].mxu1  ;;  %v5218_v45 = vpop.f32.mrb[122].mxu0 }
 0x1d0   :  { %4174 = vst.msk [vmem:[%s7604_s4 + $0x3d4] sm:$0xf] %vm3928_vm3, %v4950_v38  ;;  %v2770_v46 = vadd.f32 %v7266_v11, %v2507_v39  ;;  %v2633_v47 = vmul.f32 %v7249_v2, %v2347_v44  ;;  %v2508_v48 = vmul.f32 %v7249_v2, %v5218_v45  ;;  %v5346_v49 = vpop.f32.mrb[122].mxu1  ;;  %v1838_v50 = vpop.f32.mrb[123].mxu0 }
 0x1d1   :  { %v2898_v51 = vadd.f32 %v7266_v11, %v2635_v42  ;;  %v2768_v53 = vadd.f32 %v7266_v11, %v2505_v43  ;;  %v2636_v55 = vmul.f32 %v7249_v2, %v5346_v49  ;;  %v2506_v56 = vmul.f32 %v7249_v2, %v1838_v50  ;;  %v2350_v57 = vpop.f32.mrb[123].mxu1 }
 0x1d2   :  { %v4827_v58 = vpack.c.bf16 %v2770_v46, %v2770_v46  ;;  %v2896_v59 = vadd.f32 %v7266_v11, %v2633_v47  ;;  %v2771_v60 = vadd.f32 %v7266_v11, %v2508_v48  ;;  %v2634_v61 = vmul.f32 %v7249_v2, %v2350_v57 }
 0x1d3   :  { %v4955_v20 = vpack.c.bf16 %v2898_v51, %v2898_v51  ;;  %v4825_v62 = vpack.c.bf16 %v2768_v53, %v2768_v53  ;;  %v2899_v29 = vadd.f32 %v7266_v11, %v2636_v55  ;;  %v2769_v63 = vadd.f32 %v7266_v11, %v2506_v56 }
 0x1d4   :  { %4051 = vst.msk [vmem:[%s7604_s4 + $0x1e8] sm:$0xf] %vm3928_vm3, %v4827_v58  ;;  %v4953_v0 = vpack.c.bf16 %v2896_v59, %v2896_v59  ;;  %v4828_v1 = vpack.c.bf16 %v2771_v60, %v2771_v60  ;;  %v2897_v3 = vadd.f32 %v7266_v11, %v2634_v61 }
 0x1d5   :  { %4179 = vst.msk [vmem:[%s7604_s4 + $0x3e8] sm:$0xf] %vm3928_vm3, %v4955_v20  ;;  %4049 = vst.msk [vmem:[%s7604_s4 + $0x1e0] sm:$0xf] %vm3928_vm3, %v4825_v62  ;;  %v4956_v4 = vpack.c.bf16 %v2899_v29, %v2899_v29  ;;  %v4826_v5 = vpack.c.bf16 %v2769_v63, %v2769_v63  ;;  %v5221_v6 = vpop.f32.mrb[124].mxu0 }
 0x1d6   :  { %4177 = vst.msk [vmem:[%s7604_s4 + $0x3e0] sm:$0xf] %vm3928_vm3, %v4953_v0  ;;  %4052 = vst.msk [vmem:[%s7604_s4 + $0x1ec] sm:$0xf] %vm3928_vm3, %v4828_v1  ;;  %v4954_v7 = vpack.c.bf16 %v2897_v3, %v2897_v3  ;;  %v2511_v8 = vmul.f32 %v7249_v2, %v5221_v6  ;;  %v5349_v9 = vpop.f32.mrb[124].mxu1  ;;  %v1851_v10 = vpop.f32.mrb[125].mxu0 }
 0x1d7   :  { %4180 = vst.msk [vmem:[%s7604_s4 + $0x3ec] sm:$0xf] %vm3928_vm3, %v4956_v4  ;;  %4050 = vst.msk [vmem:[%s7604_s4 + $0x1e4] sm:$0xf] %vm3928_vm3, %v4826_v5  ;;  %v2639_v12 = vmul.f32 %v7249_v2, %v5349_v9  ;;  %v2509_v13 = vmul.f32 %v7249_v2, %v1851_v10  ;;  %v2363_v14 = vpop.f32.mrb[125].mxu1  ;;  %v5222_v15 = vpop.f32.mrb[126].mxu0 }
 0x1d8   :  { %4178 = vst.msk [vmem:[%s7604_s4 + $0x3e4] sm:$0xf] %vm3928_vm3, %v4954_v7  ;;  %v2774_v52 = vadd.f32 %v7266_v11, %v2511_v8  ;;  %v2637_v16 = vmul.f32 %v7249_v2, %v2363_v14  ;;  %v2512_v54 = vmul.f32 %v7249_v2, %v5222_v15  ;;  %v5350_v17 = vpop.f32.mrb[126].mxu1  ;;  %v1854_v18 = vpop.f32.mrb[127].mxu0 }
 0x1d9   :  { %v2902_v19 = vadd.f32 %v7266_v11, %v2639_v12  ;;  %v2772_v21 = vadd.f32 %v7266_v11, %v2509_v13  ;;  %v2640_v22 = vmul.f32 %v7249_v2, %v5350_v17  ;;  %v2510_v23 = vmul.f32 %v7249_v2, %v1854_v18  ;;  %v2366_v24 = vpop.f32.mrb[127].mxu1 }
 0x1da   :  { %v4831_v25 = vpack.c.bf16 %v2774_v52, %v2774_v52  ;;  %v2900_v26 = vadd.f32 %v7266_v11, %v2637_v16  ;;  %v2775_v27 = vadd.f32 %v7266_v11, %v2512_v54  ;;  %v2638_v28 = vmul.f32 %v7249_v2, %v2366_v24 }
 0x1db   :  { %v4959_v30 = vpack.c.bf16 %v2902_v19, %v2902_v19  ;;  %v4829_v31 = vpack.c.bf16 %v2772_v21, %v2772_v21  ;;  %v2903_v32 = vadd.f32 %v7266_v11, %v2640_v22  ;;  %v2773_v33 = vadd.f32 %v7266_v11, %v2510_v23 }
 0x1dc   :  { %4055 = vst.msk [vmem:[%s7604_s4 + $0x1f8] sm:$0xf] %vm3928_vm3, %v4831_v25  ;;  %v4957_v34 = vpack.c.bf16 %v2900_v26, %v2900_v26  ;;  %v4832_v35 = vpack.c.bf16 %v2775_v27, %v2775_v27  ;;  %v2901_v36 = vadd.f32 %v7266_v11, %v2638_v28 }
 0x1dd   :  { %4183 = vst.msk [vmem:[%s7604_s4 + $0x3f8] sm:$0xf] %vm3928_vm3, %v4959_v30  ;;  %4053 = vst.msk [vmem:[%s7604_s4 + $0x1f0] sm:$0xf] %vm3928_vm3, %v4829_v31  ;;  %v4960_v2 = vpack.c.bf16 %v2903_v32, %v2903_v32  ;;  %v4830_v37 = vpack.c.bf16 %v2773_v33, %v2773_v33 }
 0x1de   :  { %4181 = vst.msk [vmem:[%s7604_s4 + $0x3f0] sm:$0xf] %vm3928_vm3, %v4957_v34  ;;  %4056 = vst.msk [vmem:[%s7604_s4 + $0x1fc] sm:$0xf] %vm3928_vm3, %v4832_v35  ;;  %v4958_v11 = vpack.c.bf16 %v2901_v36, %v2901_v36 }
 0x1df   :  { %4184 = vst.msk [vmem:[%s7604_s4 + $0x3fc] sm:$0xf] %vm3928_vm3, %v4960_v2  ;;  %4054 = vst.msk [vmem:[%s7604_s4 + $0x1f4] sm:$0xf] %vm3928_vm3, %v4830_v37 }
 0x1e0   :  { %4182 = vst.msk [vmem:[%s7604_s4 + $0x3f4] sm:$0xf] %vm3928_vm3, %v4958_v11 }

</bundles_post_ra>
